<compile_context>
chip_gen: v6e
topology: v6e:2x2x1
jax: 0.10.0
libtpu: 0.0.40
codegen_flags: <defaults>
</compile_context>

<pallas_src>
import numpy as np
import jax
import jax.numpy as jnp
from jax.experimental import pallas as pl
from jax.experimental.pallas import tpu as pltpu

# ----------------------------- static config --------------------------------
B = 2
NDISP = 8
LEVEL = 3
IDEPTH_LEVEL = LEVEL - 2                   # level - 2
V = 2 + 10 * 4 ** IDEPTH_LEVEL             # 42 cost-volume vertices
VP = 128                                   # V padded to one full lane width
FEAT_CH = 32                               # fixed in IcoSweepNet.__init__
NCAM = 4                                   # ['cam1','cam2','cam3','cam4']
C = FEAT_CH * NCAM                         # 128 cost-volume channels
IMG_CIN, IMG_H, IMG_W = 3, 8, 16
VF = IMG_H * IMG_W                         # 128 "feature vertices" per camera
MIN_DEPTH = 0.55                           # (depth values only enter the synthetic geometry)

_HI = jax.lax.Precision.HIGHEST


# ------------------------ fused forward kernel ------------------------------
def _icosweep_kernel(wc_ref, beta_ref, x_ref, interp_ref, o_ref):
    """Fully fused IcoSweepNet forward: all cameras, depths and batch at once.

    wc_ref     : SMEM (NCAM, Cin)        folded CostRegularization∘FeatureExtraction taps
    beta_ref   : SMEM (NCAM,)            folded bias per camera
    x_ref      : VMEM (B, NCAM*Cin, VF)  stacked camera images, VF=128 lane-dense
    interp_ref : VMEM (NCAM*VF, NDISP*VP) bf16 triangle-interpolation matrix
    o_ref      : VMEM (B, VP)            soft-argmax disparity (lanes >= V are don't-care)
    """
    # 1) FeatureExtraction + CostRegularization, both linear stand-ins, folded
    #    into 3 scalar*vector FMAs per camera (VPU only -- no degenerate matmuls).
    # TODO(synk): real FeatureExtraction / CostRegularization architectures not
    # provided; modeled as per-pixel linear maps, which is what makes this
    # pre-interpolation folding exact (revisit when the real modules land).
    s_cams = []
    for cam in range(NCAM):                                   # static unroll (4)
        s = beta_ref[cam] + wc_ref[cam, 0] * x_ref[:, cam * IMG_CIN + 0, :]
        for ci in range(1, IMG_CIN):
            s = s + wc_ref[cam, ci] * x_ref[:, cam * IMG_CIN + ci, :]
        s_cams.append(s)                                      # (B, VF) f32
    s_flat = jnp.concatenate(s_cams, axis=1).astype(jnp.bfloat16)   # (B, NCAM*VF)

    # 2) triangle interpolation for every (camera, depth) + camera-channel sum:
    #    ONE lane-dense K=512 bf16 MXU contraction with f32 accumulation.
    cr = jnp.dot(s_flat, interp_ref[...],
                 preferred_element_type=jnp.float32)          # (B, NDISP*VP) f32

    # 3) DisparityRegression: softmax over depth + soft-argmax, on full-vreg
    #    (B, 128) rows (padded lanes hold zeros -> harmless, sliced off outside).
    rows = [cr[:, d * VP:(d + 1) * VP] for d in range(NDISP)]  # vreg-aligned slices
    m = rows[0]
    for r in rows[1:]:
        m = jnp.maximum(m, r)
    es = [jnp.exp(r - m) for r in rows]
    denom = es[0]
    for e in es[1:]:
        denom = denom + e
    num = jnp.zeros_like(denom)
    for d in range(1, NDISP):                                  # disparity 0 contributes 0
        num = num + float(d) * es[d]
    o_ref[...] = num * pl.reciprocal(denom, approx=True)       # (B, VP) lane-dense store


# ------------------- hoisted, per-geometry / per-weights prep ----------------
def fold_weights(params):
    """Fold the linear CostRegularization channel weights through the linear
    FeatureExtraction stand-in: one Cin-tap weight + bias per camera."""
    crw = params["cr_w"].reshape(NCAM, FEAT_CH)                          # (4, 32)
    wc = jnp.dot(crw, params["fe_w"].T, precision=_HI)                   # (4, 3)
    beta = jnp.dot(crw, params["fe_b"].reshape(FEAT_CH), precision=_HI)  # (4,)
    return wc.astype(jnp.float32), beta.astype(jnp.float32)


def build_interp_matrix(vertex_ids, weights):
    """Static sweep geometry -> bf16 triangle-interpolation matrix (built once).

    M[cam*VF + vf, d*VP + v] = sum_k weights[cam,d,k,v] * (vertex_ids[cam,d,k,v] == vf)
    so that S (B, NCAM*VF) @ M reproduces triangle_interpolation for all cameras
    and depths (summed over cameras) in a single MXU contraction.
    """
    onehot = jax.nn.one_hot(vertex_ids, VF, dtype=jnp.float32)           # (4,8,3,42,128)
    m = jnp.einsum("cdkv,cdkvf->cfdv", weights, onehot, precision=_HI)   # (4,128,8,42)
    m = jnp.pad(m, ((0, 0), (0, 0), (0, 0), (0, VP - V)))                # pad V -> 128 lanes
    return m.reshape(NCAM * VF, NDISP * VP).astype(jnp.bfloat16)


# -------------------------- forward-pass wrapper -----------------------------
def icosweepnet_forward(batch, wc, beta, interp):
    """batch: dict cam1..cam4 -> (B,3,H,W). Returns (B, 1, V) disparity."""
    bsz = batch["cam1"].shape[0]
    # eval mode => camera order is not shuffled; stack cameras channel-wise and
    # keep the pixel/"feature vertex" axis (VF=128) lane-dense (no transposes).
    x_all = jnp.concatenate(
        [batch[k].reshape(bsz, IMG_CIN, VF)
         for k in ("cam1", "cam2", "cam3", "cam4")], axis=1)     # (B, NCAM*Cin, VF)

    out_pad = pl.pallas_call(
        _icosweep_kernel,
        out_shape=jax.ShapeDtypeStruct((bsz, VP), jnp.float32),
        in_specs=[
            pl.BlockSpec(memory_space=pltpu.MemorySpace.SMEM),   # wc   (NCAM, Cin)
            pl.BlockSpec(memory_space=pltpu.MemorySpace.SMEM),   # beta (NCAM,)
            pl.BlockSpec(memory_space=pltpu.MemorySpace.VMEM),   # x_all
            pl.BlockSpec(memory_space=pltpu.MemorySpace.VMEM),   # interp (bf16)
        ],
        out_specs=pl.BlockSpec(memory_space=pltpu.MemorySpace.VMEM),
    )(wc, beta, x_all, interp)
    return out_pad[:, None, :V]                                  # (B, 1, V)


# --------------------------- pure-JAX reference ------------------------------
# Follows the PyTorch module's op order exactly: FE -> cost volume via
# triangle_interpolation per (cam, depth) -> channel reduction -> softmax ->
# soft-argmax (DisparityRegression).
def reference_forward(batch, params, sweep):
    fe_w, fe_b, cr_w = params["fe_w"], params["fe_b"], params["cr_w"]
    vertex_ids, weights = sweep["vertex_ids"], sweep["weights"]
    feats = []
    for k in ("cam1", "cam2", "cam3", "cam4"):
        x = jnp.transpose(batch[k].reshape(B, IMG_CIN, VF), (0, 2, 1))
        f = jnp.einsum("bpc,cf->bpf", x, fe_w, precision=_HI) + fe_b
        feats.append(jnp.transpose(f, (0, 2, 1)))                 # (B,F,VF)
    costs = jnp.zeros((B, C, NDISP, V), jnp.float32)
    for cam in range(NCAM):
        for d in range(NDISP):
            ids, w = vertex_ids[cam, d], weights[cam, d]          # (3,V)
            warp = (feats[cam][:, :, ids[0]] * w[0]
                    + feats[cam][:, :, ids[1]] * w[1]
                    + feats[cam][:, :, ids[2]] * w[2])            # (B,F,V)
            costs = costs.at[:, FEAT_CH * cam:FEAT_CH * (cam + 1), d, :].set(warp)
    cr = jnp.einsum("c,bcdv->bdv", cr_w[0], costs, precision=_HI) # (B,D,V)
    p = jax.nn.softmax(cr, axis=1)
    disp = jnp.arange(NDISP, dtype=jnp.float32)[None, :, None]
    return jnp.sum(p * disp, axis=1)[:, None, :]                  # (B,1,V)


# ----------------------------------- main ------------------------------------
if __name__ == "__main__":
    key = jax.random.PRNGKey(0)
    k_img, k_few, k_feb, k_crw, k_ids, k_wts = jax.random.split(key, 6)

    # deterministic example inputs: four fisheye camera images (NCHW)
    imgs = jax.random.normal(k_img, (NCAM, B, IMG_CIN, IMG_H, IMG_W), jnp.float32)
    batch = {f"cam{i + 1}": imgs[i] for i in range(NCAM)}

    # deterministic synthetic parameters (linear stand-ins, see TODOs)
    params = {
        "fe_w": 0.1 * jax.random.normal(k_few, (IMG_CIN, FEAT_CH), jnp.float32),
        "fe_b": 0.01 * jax.random.normal(k_feb, (1, FEAT_CH), jnp.float32),
        "cr_w": 0.1 * jax.random.normal(k_crw, (1, C), jnp.float32),
    }

    # TODO(synk): IcoSphericalSweeping geometry (get_grid / is_inside) not provided;
    # synthesize deterministic triangle vertex ids + positive barycentric weights
    # per (cam, depth), with every cost vertex treated as inside.
    vertex_ids = jax.random.randint(k_ids, (NCAM, NDISP, 3, V), 0, VF, jnp.int32)
    raw_w = jax.random.uniform(k_wts, (NCAM, NDISP, 3, V), jnp.float32, 0.05, 1.0)
    weights = raw_w / jnp.sum(raw_w, axis=2, keepdims=True)       # positive, sums to 1
    assert float(weights[:, :, 0].min()) > 0                      # mirrors the torch assert
    sweep = {"vertex_ids": vertex_ids, "weights": weights}

    # hoisted preprocessing: built once per geometry / parameter set, reused by
    # every forward call (not recomputed inside icosweepnet_forward).
    wc, beta = fold_weights(params)
    interp = jax.block_until_ready(build_interp_matrix(sweep["vertex_ids"],
                                                       sweep["weights"]))

    out = icosweepnet_forward(batch, wc, beta, interp)
    out = jax.block_until_ready(out)

    ref = jax.block_until_ready(reference_forward(batch, params, sweep))
    np.testing.assert_allclose(np.asarray(out), np.asarray(ref), rtol=4e-3, atol=4e-3)

    assert out.shape == (B, 1, V) and out.dtype == jnp.float32
    print("KERNEL_OK")
</pallas_src>

<mosaic_0001>
module attributes {stable_mosaic.version = 11 : i64} {
  func.func @_icosweep_kernel(%arg0: memref<4x3xf32, #tpu.memory_space<smem>>, %arg1: memref<4xf32, #tpu.memory_space<smem>>, %arg2: memref<2x12x128xf32, #tpu.memory_space<vmem>>, %arg3: memref<512x1024xbf16, #tpu.memory_space<vmem>>, %arg4: memref<2x128xf32, #tpu.memory_space<vmem>>) attributes {dimension_semantics = [], scalar_prefetch = 0 : i64, scratch_operands = 0 : i64, tpu.core_type = #tpu.core_type<tc>} {
    %c0 = arith.constant 0 : index
    %0 = memref.load %arg1[%c0] : memref<4xf32, #tpu.memory_space<smem>>
    %c0_0 = arith.constant 0 : index
    %c0_1 = arith.constant 0 : index
    %1 = memref.load %arg0[%c0_0, %c0_1] : memref<4x3xf32, #tpu.memory_space<smem>>
    %c0_2 = arith.constant 0 : index
    %c0_3 = arith.constant 0 : index
    %c0_4 = arith.constant 0 : index
    %2 = vector.load %arg2[%c0_2, %c0_3, %c0_4] : memref<2x12x128xf32, #tpu.memory_space<vmem>>, vector<2x1x128xf32>
    %3 = vector.shape_cast %2 : vector<2x1x128xf32> to vector<2x128xf32>
    %4 = vector.broadcast %1 : f32 to vector<2x128xf32>
    %5 = arith.mulf %4, %3 : vector<2x128xf32>
    %6 = vector.broadcast %0 : f32 to vector<2x128xf32>
    %7 = arith.addf %6, %5 : vector<2x128xf32>
    %c0_5 = arith.constant 0 : index
    %c1 = arith.constant 1 : index
    %8 = memref.load %arg0[%c0_5, %c1] : memref<4x3xf32, #tpu.memory_space<smem>>
    %c0_6 = arith.constant 0 : index
    %c1_7 = arith.constant 1 : index
    %c0_8 = arith.constant 0 : index
    %9 = vector.load %arg2[%c0_6, %c1_7, %c0_8] : memref<2x12x128xf32, #tpu.memory_space<vmem>>, vector<2x1x128xf32>
    %10 = vector.shape_cast %9 : vector<2x1x128xf32> to vector<2x128xf32>
    %11 = vector.broadcast %8 : f32 to vector<2x128xf32>
    %12 = arith.mulf %11, %10 : vector<2x128xf32>
    %13 = arith.addf %7, %12 : vector<2x128xf32>
    %c0_9 = arith.constant 0 : index
    %c2 = arith.constant 2 : index
    %14 = memref.load %arg0[%c0_9, %c2] : memref<4x3xf32, #tpu.memory_space<smem>>
    %c0_10 = arith.constant 0 : index
    %c2_11 = arith.constant 2 : index
    %c0_12 = arith.constant 0 : index
    %15 = vector.load %arg2[%c0_10, %c2_11, %c0_12] : memref<2x12x128xf32, #tpu.memory_space<vmem>>, vector<2x1x128xf32>
    %16 = vector.shape_cast %15 : vector<2x1x128xf32> to vector<2x128xf32>
    %17 = vector.broadcast %14 : f32 to vector<2x128xf32>
    %18 = arith.mulf %17, %16 : vector<2x128xf32>
    %19 = arith.addf %13, %18 : vector<2x128xf32>
    %c1_13 = arith.constant 1 : index
    %20 = memref.load %arg1[%c1_13] : memref<4xf32, #tpu.memory_space<smem>>
    %c1_14 = arith.constant 1 : index
    %c0_15 = arith.constant 0 : index
    %21 = memref.load %arg0[%c1_14, %c0_15] : memref<4x3xf32, #tpu.memory_space<smem>>
    %c0_16 = arith.constant 0 : index
    %c3 = arith.constant 3 : index
    %c0_17 = arith.constant 0 : index
    %22 = vector.load %arg2[%c0_16, %c3, %c0_17] : memref<2x12x128xf32, #tpu.memory_space<vmem>>, vector<2x1x128xf32>
    %23 = vector.shape_cast %22 : vector<2x1x128xf32> to vector<2x128xf32>
    %24 = vector.broadcast %21 : f32 to vector<2x128xf32>
    %25 = arith.mulf %24, %23 : vector<2x128xf32>
    %26 = vector.broadcast %20 : f32 to vector<2x128xf32>
    %27 = arith.addf %26, %25 : vector<2x128xf32>
    %c1_18 = arith.constant 1 : index
    %c1_19 = arith.constant 1 : index
    %28 = memref.load %arg0[%c1_18, %c1_19] : memref<4x3xf32, #tpu.memory_space<smem>>
    %c0_20 = arith.constant 0 : index
    %c4 = arith.constant 4 : index
    %c0_21 = arith.constant 0 : index
    %29 = vector.load %arg2[%c0_20, %c4, %c0_21] : memref<2x12x128xf32, #tpu.memory_space<vmem>>, vector<2x1x128xf32>
    %30 = vector.shape_cast %29 : vector<2x1x128xf32> to vector<2x128xf32>
    %31 = vector.broadcast %28 : f32 to vector<2x128xf32>
    %32 = arith.mulf %31, %30 : vector<2x128xf32>
    %33 = arith.addf %27, %32 : vector<2x128xf32>
    %c1_22 = arith.constant 1 : index
    %c2_23 = arith.constant 2 : index
    %34 = memref.load %arg0[%c1_22, %c2_23] : memref<4x3xf32, #tpu.memory_space<smem>>
    %c0_24 = arith.constant 0 : index
    %c5 = arith.constant 5 : index
    %c0_25 = arith.constant 0 : index
    %35 = vector.load %arg2[%c0_24, %c5, %c0_25] : memref<2x12x128xf32, #tpu.memory_space<vmem>>, vector<2x1x128xf32>
    %36 = vector.shape_cast %35 : vector<2x1x128xf32> to vector<2x128xf32>
    %37 = vector.broadcast %34 : f32 to vector<2x128xf32>
    %38 = arith.mulf %37, %36 : vector<2x128xf32>
    %39 = arith.addf %33, %38 : vector<2x128xf32>
    %c2_26 = arith.constant 2 : index
    %40 = memref.load %arg1[%c2_26] : memref<4xf32, #tpu.memory_space<smem>>
    %c2_27 = arith.constant 2 : index
    %c0_28 = arith.constant 0 : index
    %41 = memref.load %arg0[%c2_27, %c0_28] : memref<4x3xf32, #tpu.memory_space<smem>>
    %c0_29 = arith.constant 0 : index
    %c6 = arith.constant 6 : index
    %c0_30 = arith.constant 0 : index
    %42 = vector.load %arg2[%c0_29, %c6, %c0_30] : memref<2x12x128xf32, #tpu.memory_space<vmem>>, vector<2x1x128xf32>
    %43 = vector.shape_cast %42 : vector<2x1x128xf32> to vector<2x128xf32>
    %44 = vector.broadcast %41 : f32 to vector<2x128xf32>
    %45 = arith.mulf %44, %43 : vector<2x128xf32>
    %46 = vector.broadcast %40 : f32 to vector<2x128xf32>
    %47 = arith.addf %46, %45 : vector<2x128xf32>
    %c2_31 = arith.constant 2 : index
    %c1_32 = arith.constant 1 : index
    %48 = memref.load %arg0[%c2_31, %c1_32] : memref<4x3xf32, #tpu.memory_space<smem>>
    %c0_33 = arith.constant 0 : index
    %c7 = arith.constant 7 : index
    %c0_34 = arith.constant 0 : index
    %49 = vector.load %arg2[%c0_33, %c7, %c0_34] : memref<2x12x128xf32, #tpu.memory_space<vmem>>, vector<2x1x128xf32>
    %50 = vector.shape_cast %49 : vector<2x1x128xf32> to vector<2x128xf32>
    %51 = vector.broadcast %48 : f32 to vector<2x128xf32>
    %52 = arith.mulf %51, %50 : vector<2x128xf32>
    %53 = arith.addf %47, %52 : vector<2x128xf32>
    %c2_35 = arith.constant 2 : index
    %c2_36 = arith.constant 2 : index
    %54 = memref.load %arg0[%c2_35, %c2_36] : memref<4x3xf32, #tpu.memory_space<smem>>
    %c0_37 = arith.constant 0 : index
    %c8 = arith.constant 8 : index
    %c0_38 = arith.constant 0 : index
    %55 = vector.load %arg2[%c0_37, %c8, %c0_38] : memref<2x12x128xf32, #tpu.memory_space<vmem>>, vector<2x1x128xf32>
    %56 = vector.shape_cast %55 : vector<2x1x128xf32> to vector<2x128xf32>
    %57 = vector.broadcast %54 : f32 to vector<2x128xf32>
    %58 = arith.mulf %57, %56 : vector<2x128xf32>
    %59 = arith.addf %53, %58 : vector<2x128xf32>
    %c3_39 = arith.constant 3 : index
    %60 = memref.load %arg1[%c3_39] : memref<4xf32, #tpu.memory_space<smem>>
    %c3_40 = arith.constant 3 : index
    %c0_41 = arith.constant 0 : index
    %61 = memref.load %arg0[%c3_40, %c0_41] : memref<4x3xf32, #tpu.memory_space<smem>>
    %c0_42 = arith.constant 0 : index
    %c9 = arith.constant 9 : index
    %c0_43 = arith.constant 0 : index
    %62 = vector.load %arg2[%c0_42, %c9, %c0_43] : memref<2x12x128xf32, #tpu.memory_space<vmem>>, vector<2x1x128xf32>
    %63 = vector.shape_cast %62 : vector<2x1x128xf32> to vector<2x128xf32>
    %64 = vector.broadcast %61 : f32 to vector<2x128xf32>
    %65 = arith.mulf %64, %63 : vector<2x128xf32>
    %66 = vector.broadcast %60 : f32 to vector<2x128xf32>
    %67 = arith.addf %66, %65 : vector<2x128xf32>
    %c3_44 = arith.constant 3 : index
    %c1_45 = arith.constant 1 : index
    %68 = memref.load %arg0[%c3_44, %c1_45] : memref<4x3xf32, #tpu.memory_space<smem>>
    %c0_46 = arith.constant 0 : index
    %c10 = arith.constant 10 : index
    %c0_47 = arith.constant 0 : index
    %69 = vector.load %arg2[%c0_46, %c10, %c0_47] : memref<2x12x128xf32, #tpu.memory_space<vmem>>, vector<2x1x128xf32>
    %70 = vector.shape_cast %69 : vector<2x1x128xf32> to vector<2x128xf32>
    %71 = vector.broadcast %68 : f32 to vector<2x128xf32>
    %72 = arith.mulf %71, %70 : vector<2x128xf32>
    %73 = arith.addf %67, %72 : vector<2x128xf32>
    %c3_48 = arith.constant 3 : index
    %c2_49 = arith.constant 2 : index
    %74 = memref.load %arg0[%c3_48, %c2_49] : memref<4x3xf32, #tpu.memory_space<smem>>
    %c0_50 = arith.constant 0 : index
    %c11 = arith.constant 11 : index
    %c0_51 = arith.constant 0 : index
    %75 = vector.load %arg2[%c0_50, %c11, %c0_51] : memref<2x12x128xf32, #tpu.memory_space<vmem>>, vector<2x1x128xf32>
    %76 = vector.shape_cast %75 : vector<2x1x128xf32> to vector<2x128xf32>
    %77 = vector.broadcast %74 : f32 to vector<2x128xf32>
    %78 = arith.mulf %77, %76 : vector<2x128xf32>
    %79 = arith.addf %73, %78 : vector<2x128xf32>
    %80 = tpu.concatenate %19, %39, %59, %79 in 1 : vector<2x128xf32>, vector<2x128xf32>, vector<2x128xf32>, vector<2x128xf32> -> vector<2x512xf32>
    %81 = arith.truncf %80 : vector<2x512xf32> to vector<2x512xbf16>
    %c0_52 = arith.constant 0 : index
    %c0_53 = arith.constant 0 : index
    %82 = vector.load %arg3[%c0_52, %c0_53] : memref<512x1024xbf16, #tpu.memory_space<vmem>>, vector<512x1024xbf16>
    %cst = arith.constant dense<0.000000e+00> : vector<2x1024xf32>
    %83 = tpu.matmul %81, %82, %cst {dimension_numbers = #tpu.dot_dimension_numbers<[1], [0], [0], [1], [0, 0, 1, 1], [], []>} : vector<2x512xbf16>, vector<512x1024xbf16>, vector<2x1024xf32> -> vector<2x1024xf32>
    %84 = vector.extract_strided_slice %83 {offsets = [0, 0], sizes = [2, 128], strides = [1, 1]} : vector<2x1024xf32> to vector<2x128xf32>
    %85 = vector.extract_strided_slice %83 {offsets = [0, 128], sizes = [2, 128], strides = [1, 1]} : vector<2x1024xf32> to vector<2x128xf32>
    %86 = vector.extract_strided_slice %83 {offsets = [0, 256], sizes = [2, 128], strides = [1, 1]} : vector<2x1024xf32> to vector<2x128xf32>
    %87 = vector.extract_strided_slice %83 {offsets = [0, 384], sizes = [2, 128], strides = [1, 1]} : vector<2x1024xf32> to vector<2x128xf32>
    %88 = vector.extract_strided_slice %83 {offsets = [0, 512], sizes = [2, 128], strides = [1, 1]} : vector<2x1024xf32> to vector<2x128xf32>
    %89 = vector.extract_strided_slice %83 {offsets = [0, 640], sizes = [2, 128], strides = [1, 1]} : vector<2x1024xf32> to vector<2x128xf32>
    %90 = vector.extract_strided_slice %83 {offsets = [0, 768], sizes = [2, 128], strides = [1, 1]} : vector<2x1024xf32> to vector<2x128xf32>
    %91 = vector.extract_strided_slice %83 {offsets = [0, 896], sizes = [2, 128], strides = [1, 1]} : vector<2x1024xf32> to vector<2x128xf32>
    %92 = arith.maximumf %84, %85 : vector<2x128xf32>
    %93 = arith.maximumf %92, %86 : vector<2x128xf32>
    %94 = arith.maximumf %93, %87 : vector<2x128xf32>
    %95 = arith.maximumf %94, %88 : vector<2x128xf32>
    %96 = arith.maximumf %95, %89 : vector<2x128xf32>
    %97 = arith.maximumf %96, %90 : vector<2x128xf32>
    %98 = arith.maximumf %97, %91 : vector<2x128xf32>
    %99 = arith.subf %84, %98 : vector<2x128xf32>
    %100 = math.exp %99 : vector<2x128xf32>
    %101 = arith.subf %85, %98 : vector<2x128xf32>
    %102 = math.exp %101 : vector<2x128xf32>
    %103 = arith.subf %86, %98 : vector<2x128xf32>
    %104 = math.exp %103 : vector<2x128xf32>
    %105 = arith.subf %87, %98 : vector<2x128xf32>
    %106 = math.exp %105 : vector<2x128xf32>
    %107 = arith.subf %88, %98 : vector<2x128xf32>
    %108 = math.exp %107 : vector<2x128xf32>
    %109 = arith.subf %89, %98 : vector<2x128xf32>
    %110 = math.exp %109 : vector<2x128xf32>
    %111 = arith.subf %90, %98 : vector<2x128xf32>
    %112 = math.exp %111 : vector<2x128xf32>
    %113 = arith.subf %91, %98 : vector<2x128xf32>
    %114 = math.exp %113 : vector<2x128xf32>
    %115 = arith.addf %100, %102 : vector<2x128xf32>
    %116 = arith.addf %115, %104 : vector<2x128xf32>
    %117 = arith.addf %116, %106 : vector<2x128xf32>
    %118 = arith.addf %117, %108 : vector<2x128xf32>
    %119 = arith.addf %118, %110 : vector<2x128xf32>
    %120 = arith.addf %119, %112 : vector<2x128xf32>
    %121 = arith.addf %120, %114 : vector<2x128xf32>
    %cst_54 = arith.constant 0.000000e+00 : f32
    %122 = vector.broadcast %cst_54 : f32 to vector<2x128xf32>
    %cst_55 = arith.constant 1.000000e+00 : f32
    %123 = vector.broadcast %cst_55 : f32 to vector<2x128xf32>
    %124 = arith.mulf %123, %102 : vector<2x128xf32>
    %125 = arith.addf %122, %124 : vector<2x128xf32>
    %cst_56 = arith.constant 2.000000e+00 : f32
    %126 = vector.broadcast %cst_56 : f32 to vector<2x128xf32>
    %127 = arith.mulf %126, %104 : vector<2x128xf32>
    %128 = arith.addf %125, %127 : vector<2x128xf32>
    %cst_57 = arith.constant 3.000000e+00 : f32
    %129 = vector.broadcast %cst_57 : f32 to vector<2x128xf32>
    %130 = arith.mulf %129, %106 : vector<2x128xf32>
    %131 = arith.addf %128, %130 : vector<2x128xf32>
    %cst_58 = arith.constant 4.000000e+00 : f32
    %132 = vector.broadcast %cst_58 : f32 to vector<2x128xf32>
    %133 = arith.mulf %132, %108 : vector<2x128xf32>
    %134 = arith.addf %131, %133 : vector<2x128xf32>
    %cst_59 = arith.constant 5.000000e+00 : f32
    %135 = vector.broadcast %cst_59 : f32 to vector<2x128xf32>
    %136 = arith.mulf %135, %110 : vector<2x128xf32>
    %137 = arith.addf %134, %136 : vector<2x128xf32>
    %cst_60 = arith.constant 6.000000e+00 : f32
    %138 = vector.broadcast %cst_60 : f32 to vector<2x128xf32>
    %139 = arith.mulf %138, %112 : vector<2x128xf32>
    %140 = arith.addf %137, %139 : vector<2x128xf32>
    %cst_61 = arith.constant 7.000000e+00 : f32
    %141 = vector.broadcast %cst_61 : f32 to vector<2x128xf32>
    %142 = arith.mulf %141, %114 : vector<2x128xf32>
    %143 = arith.addf %140, %142 : vector<2x128xf32>
    %144 = tpu.reciprocal %121 {approx = true} : vector<2x128xf32> -> vector<2x128xf32>
    %145 = arith.mulf %143, %144 : vector<2x128xf32>
    %c0_62 = arith.constant 0 : index
    %c0_63 = arith.constant 0 : index
    %146 = vector.load %arg4[%c0_62, %c0_63] : memref<2x128xf32, #tpu.memory_space<vmem>>, vector<2x128xf32>
    tpu.vector_store %arg4[%c0_62, %c0_63], %145 {strides = array<i32>} : memref<2x128xf32, #tpu.memory_space<vmem>>, vector<2x128xf32>,
    return
  }
}

</mosaic_0001>

<bundles_post_ra>
// kernel: tpu_custom_call.1
= control target key start
LH: loop header
LB: loop body
LE: loop exit
PB: predicated region body
PF: predicated region fallthrough
CT: control target
= control target key end

     0   :  { %9 = vsyncpa [#allocation5], 0  ;;  %s2714_s0 = inlined_call_operand.vmem [shape: f32[4,3], index: 0, kind: input, shape index: {}]   ;;  %s2715_s1 = inlined_call_operand.vmem [shape: f32[4], index: 1, kind: input, shape index: {}]   ;;  %s2716_s2 = inlined_call_operand.vmem [shape: f32[2,12,128], index: 2, kind: input, shape index: {}]   ;;  %s2717_s3 = inlined_call_operand.hbm [shape: bf16[512,1024], index: 3, kind: input, shape index: {}]   ;;  %s2718_s4 = inlined_call_operand.hbm [shape: f32[2,128], index: 4, kind: output, shape index: {}]  }
   0x1   :  { %10 = vsyncpa [#allocation7], 0 }
   0x2   :  { %11 = vsyncpa [#allocation3], 0 }
   0x3   :  { %12 = vsyncpa [#allocation4], 0  ;;  %s19_s17 = sshll.u32 %s2714_s0, 4  ;;  %s29_s20 = sshll.u32 %s2715_s1, 4  ;;  %s20_s17 = int_to_ptr.vmem [resolvable:$true] %s19_s17  ;;  %s30_s20 = int_to_ptr.vmem [resolvable:$true] %s29_s20 }
   0x4   :  { %s2415_s21 = scalar_lea.vmem %s20_s17, 64  ;;  %p2420_p1 = scmp.lt.s32.totalorder %s20_s17, %s20_s17 }
   0x5   :  { %p2416_p0 = scmp.ne.s32.totalorder %s20_s17, %s2415_s21  ;;  %p2421_p2 = scmp.lt.s32.totalorder %s2415_s21, %s2415_s21 }
   0x7   :  { %p2422_p3 = por %p2421_p2, %p2420_p1 }
   0x9   :  { %p2423_p4 = pnand %p2422_p3, %p2416_p0 }
   0xb   :  { %2426 = shalt.err (!%p2423_p4)
}
   0xc   :  { %s2487_s22 = smov [#allocation2]   ;;  %s2427_s23 = scalar_lea.vmem %s30_s20, 16 }
   0xd   :  { %22 = dma.vmem_to_smem %s20_s17, 64, %s2487_s22, [#allocation5]  }
   0xe   :  { %p2428_p5 = scmp.ne.s32.totalorder %s30_s20, %s2427_s23  ;;  %p2432_p6 = scmp.lt.s32.totalorder %s30_s20, %s30_s20 }
   0xf   :  { %p2433_p7 = scmp.lt.s32.totalorder %s2427_s23, %s2427_s23 }
  0x11   :  { %p2434_p8 = por %p2433_p7, %p2432_p6 }
  0x13   :  { %p2435_p9 = pnand %p2434_p8, %p2428_p5 }
  0x15   :  { %2438 = shalt.err (!%p2435_p9)
}
  0x16   :  { %s2488_s0 = smov [#allocation6]   ;;  %s2489_s1 = smov [#allocation8]  }
  0x17   :  { %32 = dma.vmem_to_smem %s30_s20, 16, %s2488_s0, [#allocation7]  }
  0x18   :  { %s40_s24 = sshll.u32 %s2489_s1, 4  ;;  %s41_s24 = int_to_ptr.vmem [resolvable:$true] %s40_s24 }
  0x19   :  { %s2447_s25 = scalar_lea.vmem %s41_s24, 32768  ;;  %p2452_p11 = scmp.lt.s32.totalorder %s41_s24, %s41_s24 }
  0x1a   :  { %p2448_p10 = scmp.ne.s32.totalorder %s41_s24, %s2447_s25  ;;  %p2453_p12 = scmp.lt.s32.totalorder %s2447_s25, %s2447_s25 }
  0x1c   :  { %p2454_p13 = por %p2453_p12, %p2452_p11 }
  0x1e   :  { %p2455_p0 = pnand %p2454_p13, %p2448_p10 }
  0x20   :  { %2458 = shalt.err (!%p2455_p0)
}
  0x21   :  { %s2490_s26 = smov 512   ;;  %s2491_s27 = smov 32  }
  0x22   :  { %46 = dma.hbm_to_vmem [thread:$0]  %s2717_s3, 32768, %s41_s24, [#allocation3], %s2490_s26, %s2490_s26, %s2491_s27  }
  0x23   :  { %2479 = dma.done.wait [#allocation5], 64  }
  0x24   :  { %2480 = vsyncadd [#allocation5], 4294967232 }
  0x25   :  { %2481 = dma.done.wait [#allocation7], 16  }
  0x26   :  { %2482 = vsyncadd [#allocation7], 4294967280 }
  0x27   :  { %2483 = dma.done.wait [#allocation3], 32768  }
  0x28   :  { %2484 = vsyncadd [#allocation3], 4294934528 }
  0x29   :  { %56 = sfence }
  0x2a   :  { %v242_v0 = vld [vmem:[#allocation8 + $0x1c0] sm:$0xff]  ;;  %s2527_s3 = sld [smem:[#allocation6 + $0x1]]  ;;  %vm164_vm0 = vcmask 1041409  }
  0x2b   :  { %v246_v1 = vld [vmem:[#allocation8 + $0x1e0] sm:$0xff]  ;;  %s2529_s30 = sld [smem:[#allocation2 + $0x80]] }
  0x2c   :  { %v370_v2 = vld [vmem:[#allocation8 + $0x5c0] sm:$0xff]  ;;  %v2192_v3 = vcombine.high %v242_v0, %v246_v1  ;;  %v2191_v5 = vcombine.low %v242_v0, %v246_v1  ;;  %s2531_s5 = sld [smem:[#allocation2 + $0x81]]  ;;  %v86_v1 = vld [vmem:[%s2716_s2 + $0x13] sm:$0x1] }
  0x2d   :  { %v374_v4 = vld [vmem:[#allocation8 + $0x5e0] sm:$0xff]  ;;  %s2533_s6 = sld [smem:[#allocation2 + $0x82]] }
  0x2e   :  { %v234_v6 = vld [vmem:[#allocation8 + $0x180] sm:$0xff]  ;;  %v2320_v8 = vcombine.high %v370_v2, %v374_v4  ;;  %v2319_v9 = vcombine.low %v370_v2, %v374_v4  ;;  %1722 = vmatprep.subr.bf16.mxu0 %v2192_v3  ;;  %s2535_s7 = sld [smem:[#allocation6 + $0x3]] }
  0x2f   :  { %v238_v7 = vld [vmem:[#allocation8 + $0x1a0] sm:$0xff]  ;;  %1723 = vmatpush1.bf16.msra.mxu0 %v2191_v5  ;;  %s2537_s8 = sld [smem:[#allocation2 + $0x180]] }
  0x30   :  { %v2184_v10 = vcombine.high %v234_v6, %v238_v7  ;;  %v362_v11 = vld [vmem:[#allocation8 + $0x580] sm:$0xff]  ;;  %1763 = vmatprep.subr.bf16.mxu1 %v2320_v8  ;;  %v2183_v18 = vcombine.low %v234_v6, %v238_v7  ;;  %s2539_s9 = sld [smem:[#allocation2 + $0x181]]  ;;  %v90_v55 = vstv %s2527_s3  ;;  %v95_v8 = vld [vmem:[%s2716_s2 + $0x14] sm:$0x1] }
  0x31   :  { %v366_v12 = vld [vmem:[#allocation8 + $0x5a0] sm:$0xff]  ;;  %1764 = vmatpush1.bf16.msra.mxu1 %v2319_v9  ;;  %s2541_s10 = sld [smem:[#allocation2 + $0x182]]  ;;  %v87_v54 = vstv %s2529_s30 }
  0x32   :  { %v226_v13 = vld [vmem:[#allocation8 + $0x140] sm:$0xff]  ;;  %v2312_v14 = vcombine.high %v362_v11, %v366_v12  ;;  %1724 = vmatprep.subr.bf16.mxu0 %v2184_v10  ;;  %v2311_v19 = vcombine.low %v362_v11, %v366_v12  ;;  %v96_v58 = vstv %s2531_s5  ;;  %v89_v6 = vmul.f32 %v87_v54, %v86_v1  ;;  %s2632_s11 = sld [smem:[#allocation2 + $0x101]] }
  0x33   :  { %v230_v15 = vld [vmem:[#allocation8 + $0x160] sm:$0xff]  ;;  %1725 = vmatpush1.bf16.msra.mxu0 %v2183_v18  ;;  %v104_v59 = vstv %s2533_s6  ;;  %v98_v12 = vmul.f32 %v96_v58, %v95_v8  ;;  %s2619_s6 = sld [smem:[#allocation2]] }
  0x34   :  { %v354_v16 = vld [vmem:[#allocation8 + $0x540] sm:$0xff]  ;;  %v2176_v20 = vcombine.high %v226_v13, %v230_v15  ;;  %1765 = vmatprep.subr.bf16.mxu1 %v2312_v14  ;;  %v2175_v26 = vcombine.low %v226_v13, %v230_v15  ;;  %v142_v3 = vstv %s2535_s7  ;;  %v103_v13 = vld [vmem:[%s2716_s2 + $0x15] sm:$0x1]  ;;  %v137_v15 = vld [vmem:[%s2716_s2 + $0x9] sm:$0x1]  ;;  %s2621_s7 = sld [smem:[#allocation2 + $0x100]] }
  0x35   :  { %v358_v17 = vld [vmem:[#allocation8 + $0x560] sm:$0xff]  ;;  %1766 = vmatpush1.bf16.msra.mxu1 %v2311_v19  ;;  %v139_v2 = vstv %s2537_s8  ;;  %v92_v19 = vadd.f32 %v90_v55, %v89_v6  ;;  %s2623_s8 = sld [smem:[#allocation6]] }
  0x36   :  { %v2304_v21 = vcombine.high %v354_v16, %v358_v17  ;;  %v218_v22 = vld [vmem:[#allocation8 + $0x100] sm:$0xff]  ;;  %1726 = vmatprep.subr.bf16.mxu0 %v2176_v20  ;;  %v2303_v27 = vcombine.low %v354_v16, %v358_v17  ;;  %v148_v10 = vstv %s2539_s9  ;;  %v138_v16 = vld [vmem:[%s2716_s2 + $0x19] sm:$0x1]  ;;  %v106_v20 = vmul.f32 %v104_v59, %v103_v13  ;;  %s2626_s9 = sld [smem:[#allocation2 + $0x1]] }
  0x37   :  { %v222_v23 = vld [vmem:[#allocation8 + $0x120] sm:$0xff]  ;;  %1727 = vmatpush1.bf16.msra.mxu0 %v2175_v26  ;;  %v156_v17 = vstv %s2541_s10  ;;  %s2630_s10 = sld [smem:[#allocation6 + $0x2]] }
  0x38   :  { %v346_v24 = vld [vmem:[#allocation8 + $0x500] sm:$0xff]  ;;  %v2168_v28 = vcombine.high %v218_v22, %v222_v23  ;;  %1767 = vmatprep.subr.bf16.mxu1 %v2304_v21  ;;  %v2167_v34 = vcombine.low %v218_v22, %v222_v23  ;;  %v140_v21 = vmul.f32 %v139_v2, %v137_v15  ;;  %v146_v22 = vld [vmem:[%s2716_s2 + $0xa] sm:$0x1]  ;;  %v147_v23 = vld [vmem:[%s2716_s2 + $0x1a] sm:$0x1]  ;;  %s2642_s14 = sld [smem:[#allocation2 + $0x2]] }
  0x39   :  { %v350_v25 = vld [vmem:[#allocation8 + $0x520] sm:$0xff]  ;;  %1768 = vmatpush1.bf16.msra.mxu1 %v2303_v27  ;;  %v149_v26 = vmul.f32 %v148_v10, %v146_v22  ;;  %v150_v27 = vmul.f32 %v148_v10, %v147_v23  ;;  %v61_v8 = vstv %s2619_s6  ;;  %s2649_s17 = sld [smem:[#allocation2 + $0x102]] }
  0x3a   :  { %v2296_v29 = vcombine.high %v346_v24, %v350_v25  ;;  %v210_v30 = vld [vmem:[#allocation8 + $0xc0] sm:$0xff]  ;;  %1728 = vmatprep.subr.bf16.mxu0 %v2168_v28  ;;  %v2295_v35 = vcombine.low %v346_v24, %v350_v25  ;;  %v154_v24 = vld [vmem:[%s2716_s2 + $0xb] sm:$0x1]  ;;  %v141_v25 = vmul.f32 %v139_v2, %v138_v16  ;;  %v155_v28 = vld [vmem:[%s2716_s2 + $0x1b] sm:$0x1]  ;;  %v113_v13 = vstv %s2621_s7 }
  0x3b   :  { %v214_v31 = vld [vmem:[#allocation8 + $0xe0] sm:$0xff]  ;;  %1729 = vmatpush1.bf16.msra.mxu0 %v2167_v34  ;;  %v143_v34 = vadd.f32 %v142_v3, %v140_v21  ;;  %v64_v23 = vstv %s2623_s8 }
  0x3c   :  { %v338_v32 = vld [vmem:[#allocation8 + $0x4c0] sm:$0xff]  ;;  %v2160_v36 = vcombine.high %v210_v30, %v214_v31  ;;  %1769 = vmatprep.subr.bf16.mxu1 %v2296_v29  ;;  %v2159_v42 = vcombine.low %v210_v30, %v214_v31 }
  0x3d   :  { %v342_v33 = vld [vmem:[#allocation8 + $0x4e0] sm:$0xff]  ;;  %1770 = vmatpush1.bf16.msra.mxu1 %v2295_v35 }
  0x3e   :  { %v2288_v37 = vcombine.high %v338_v32, %v342_v33  ;;  %v202_v38 = vld [vmem:[#allocation8 + $0x80] sm:$0xff]  ;;  %1730 = vmatprep.subr.bf16.mxu0 %v2160_v36  ;;  %v2287_v43 = vcombine.low %v338_v32, %v342_v33  ;;  %v100_v33 = vadd.f32 %v98_v12, %v92_v19  ;;  %v112_v12 = vld [vmem:[%s2716_s2 + $0x16] sm:$0x1] }
  0x3f   :  { %v206_v39 = vld [vmem:[#allocation8 + $0xa0] sm:$0xff]  ;;  %1731 = vmatpush1.bf16.msra.mxu0 %v2159_v42 }
  0x40   :  { %v330_v40 = vld [vmem:[#allocation8 + $0x480] sm:$0xff]  ;;  %v2152_v44 = vcombine.high %v202_v38, %v206_v39  ;;  %1771 = vmatprep.subr.bf16.mxu1 %v2288_v37  ;;  %v2151_v50 = vcombine.low %v202_v38, %v206_v39  ;;  %v144_v37 = vadd.f32 %v142_v3, %v141_v25  ;;  %v157_v38 = vmul.f32 %v156_v17, %v154_v24  ;;  %v69_v24 = vld [vmem:[%s2716_s2 + $0x11] sm:$0x1] }
  0x41   :  { %v334_v41 = vld [vmem:[#allocation8 + $0x4a0] sm:$0xff]  ;;  %1772 = vmatpush1.bf16.msra.mxu1 %v2287_v43  ;;  %v158_v39 = vmul.f32 %v156_v17, %v155_v28  ;;  %v108_v42 = vadd.f32 %v106_v20, %v100_v33  ;;  %v151_v43 = vadd.f32 %v149_v26, %v143_v34  ;;  %v70_v25 = vstv %s2626_s9 }
  0x42   :  { %v2543_v45 = vld [vmem:[#allocation8 + $0x40] sm:$0xff]  ;;  %v2280_v47 = vcombine.high %v330_v40, %v334_v41  ;;  %v2279_v51 = vcombine.low %v330_v40, %v334_v41  ;;  %1732 = vmatprep.subr.bf16.mxu0 %v2152_v44  ;;  %v115_v26 = vmul.f32 %v113_v13, %v112_v12 }
  0x43   :  { %v2545_v46 = vld [vmem:[#allocation8 + $0x60] sm:$0xff]  ;;  %1733 = vmatpush1.bf16.msra.mxu0 %v2151_v50  ;;  %v169_v50 = vrot.slane %v108_v42, 7  ;;  %v72_v42 = vmul.f32 %v70_v25, %v69_v24 }
  0x44   :  { %v2547_v48 = vld [vmem:[#allocation8 + $0x440] sm:$0xff]  ;;  %v2144_v56 = vcombine.high %v2543_v45, %v2545_v46  ;;  %v2143_v57 = vcombine.low %v2543_v45, %v2545_v46  ;;  %1773 = vmatprep.subr.bf16.mxu1 %v2280_v47  ;;  %v152_v46 = vadd.f32 %v150_v27, %v144_v37 }
  0x45   :  { %v2549_v49 = vld [vmem:[#allocation8 + $0x460] sm:$0xff]  ;;  %1774 = vmatpush1.bf16.msra.mxu1 %v2279_v51 }
  0x46   :  { %v2551_v52 = vld [vmem:[#allocation8] sm:$0xff]  ;;  %v2272_v60 = vcombine.high %v2547_v48, %v2549_v49  ;;  %v2271_v61 = vcombine.low %v2547_v48, %v2549_v49  ;;  %1734 = vmatprep.subr.bf16.mxu0 %v2144_v56 }
  0x47   :  { %v2553_v53 = vld [vmem:[#allocation8 + $0x20] sm:$0xff]  ;;  %1735 = vmatpush1.bf16.msra.mxu0 %v2143_v57 }
  0x48   :  { %v2567_v62 = vld [vmem:[#allocation8 + $0x400] sm:$0xff]  ;;  %v2136_v4 = vcombine.high %v2551_v52, %v2553_v53  ;;  %1775 = vmatprep.subr.bf16.mxu1 %v2272_v60  ;;  %v2135_v40 = vcombine.low %v2551_v52, %v2553_v53  ;;  %v159_v53 = vadd.f32 %v157_v38, %v151_v43  ;;  %v77_v43 = vld [vmem:[%s2716_s2 + $0x12] sm:$0x1] }
  0x49   :  { %v2569_v63 = vld [vmem:[#allocation8 + $0x420] sm:$0xff]  ;;  %1776 = vmatpush1.bf16.msra.mxu1 %v2271_v61 }
  0x4a   :  { %v85_v0 = vld [vmem:[%s2716_s2 + $0x3] sm:$0x1]  ;;  %v94_v7 = vld [vmem:[%s2716_s2 + $0x4] sm:$0x1]  ;;  %v102_v9 = vld [vmem:[%s2716_s2 + $0x5] sm:$0x1]  ;;  %v2264_v29 = vcombine.high %v2567_v62, %v2569_v63  ;;  %1736 = vmatprep.subr.bf16.mxu0 %v2136_v4  ;;  %v2263_v44 = vcombine.low %v2567_v62, %v2569_v63 }
  0x4b   :  { %v88_v5 = vmul.f32 %v87_v54, %v85_v0  ;;  %v97_v11 = vmul.f32 %v96_v58, %v94_v7  ;;  %v105_v14 = vmul.f32 %v104_v59, %v102_v9  ;;  %v306_v30 = vld [vmem:[#allocation8 + $0x3c0] sm:$0xff]  ;;  %v160_v54 = vadd.f32 %v158_v39, %v152_v46  ;;  %1737 = vmatpush1.bf16.msra.mxu0 %v2135_v40  ;;  %v60_v7 = vld [vmem:[%s2716_s2 + $0x10] sm:$0x1] }
  0x4c   :  { %v310_v31 = vld [vmem:[#allocation8 + $0x3e0] sm:$0xff]  ;;  %1777 = vmatprep.subr.bf16.mxu1 %v2264_v29  ;;  %v63_v19 = vmul.f32 %v61_v8, %v60_v7  ;;  %v116_v29 = vstv %s2630_s10  ;;  %v128_v7 = vld [vmem:[%s2716_s2 + $0x8] sm:$0x1] }
  0x4d   :  { %v91_v18 = vadd.f32 %v90_v55, %v88_v5  ;;  %v434_v35 = vld [vmem:[#allocation8 + $0x7c0] sm:$0xff]  ;;  %v2256_v45 = vcombine.high %v306_v30, %v310_v31  ;;  %v2255_v55 = vcombine.low %v306_v30, %v310_v31  ;;  %1778 = vmatpush1.bf16.msra.mxu1 %v2263_v44  ;;  %v179_v60 = vrot.slane %v160_v54, 7  ;;  %v121_v30 = vld [vmem:[%s2716_s2 + $0x17] sm:$0x1] }
  0x4e   :  { %v438_v36 = vld [vmem:[#allocation8 + $0x7e0] sm:$0xff]  ;;  %v122_v31 = vstv %s2632_s11  ;;  %v66_v40 = vadd.f32 %v64_v23, %v63_v19  ;;  %v78_v44 = vstv %s2642_s14  ;;  %v118_v46 = vadd.f32 %v116_v29, %v115_v26 }
  0x4f   :  { %v99_v32 = vadd.f32 %v97_v11, %v91_v18  ;;  %v2384_v47 = vcombine.high %v434_v35, %v438_v36  ;;  %v298_v48 = vld [vmem:[#allocation8 + $0x380] sm:$0xff]  ;;  %1738 = vmatprep.subr.bf16.mxu0 %v2256_v45  ;;  %v2383_v57 = vcombine.low %v434_v35, %v438_v36  ;;  %v180_v2 = vsel %vm164_vm0, %v179_v60, %v159_v53 }
  0x50   :  { %v302_v49 = vld [vmem:[#allocation8 + $0x3a0] sm:$0xff]  ;;  %1739 = vmatpush2.bf16.msra.mxu0 %v2255_v55  ;;  %v2636_v4 = vpack.c.bf16 %v180_v2, %v180_v2  ;;  %v74_v60 = vadd.f32 %v72_v42, %v66_v40  ;;  %v235_v42 = vld [vmem:[#allocation8 + $0x188] sm:$0xff] }
  0x51   :  { %v107_v41 = vadd.f32 %v105_v14, %v99_v32  ;;  %v426_v51 = vld [vmem:[#allocation8 + $0x780] sm:$0xff]  ;;  %v2248_v58 = vcombine.high %v298_v48, %v302_v49  ;;  %1779 = vmatprep.subr.bf16.mxu1 %v2384_v47  ;;  %v2247_v3 = vcombine.low %v298_v48, %v302_v49  ;;  %v124_v48 = vmul.f32 %v122_v31, %v121_v30 }
  0x52   :  { %v430_v52 = vld [vmem:[#allocation8 + $0x7a0] sm:$0xff]  ;;  %1780 = vmatpush2.bf16.msra.mxu1 %v2383_v57  ;;  %1795 = vmatprep.mubr.bf16.mxu1 %v2636_v4 }
  0x53   :  { %v170_v56 = vsel %vm164_vm0, %v169_v50, %v107_v41  ;;  %v2376_v61 = vcombine.high %v426_v51, %v430_v52  ;;  %v290_v62 = vld [vmem:[#allocation8 + $0x340] sm:$0xff]  ;;  %1740 = vmatprep.subr.bf16.mxu0 %v2248_v58  ;;  %v2375_v5 = vcombine.low %v426_v51, %v430_v52  ;;  %v129_v50 = vld [vmem:[%s2716_s2 + $0x18] sm:$0x1]  ;;  %v130_v51 = vstv %s2649_s17 }
  0x54   :  { %v2628_v59 = vpack.c.bf16 %v170_v56, %v170_v56  ;;  %v294_v63 = vld [vmem:[#allocation8 + $0x360] sm:$0xff]  ;;  %1741 = vmatpush2.bf16.msra.mxu0 %v2247_v3  ;;  %v126_v3 = vadd.f32 %v124_v48, %v118_v46  ;;  %v367_v46 = vld [vmem:[#allocation8 + $0x5a8] sm:$0xff] }
  0x55   :  { %v418_v0 = vld [vmem:[#allocation8 + $0x740] sm:$0xff]  ;;  %v2240_v6 = vcombine.high %v290_v62, %v294_v63  ;;  %1781 = vmatprep.subr.bf16.mxu1 %v2376_v61  ;;  %v2239_v16 = vcombine.low %v290_v62, %v294_v63  ;;  %v80_v61 = vmul.f32 %v78_v44, %v77_v43  ;;  %v239_v43 = vld [vmem:[#allocation8 + $0x1a8] sm:$0xff] }
  0x56   :  { %v422_v1 = vld [vmem:[#allocation8 + $0x760] sm:$0xff]  ;;  %1754 = vmatprep.mubr.bf16.mxu0 %v2628_v59  ;;  %1782 = vmatpush2.bf16.msra.mxu1 %v2375_v5  ;;  %v132_v5 = vmul.f32 %v130_v51, %v129_v50  ;;  %v2186_v50 = vcombine.high %v235_v42, %v239_v43 }
  0x57   :  { %v2368_v9 = vcombine.high %v418_v0, %v422_v1  ;;  %v282_v10 = vld [vmem:[#allocation8 + $0x300] sm:$0xff]  ;;  %v2367_v17 = vcombine.low %v418_v0, %v422_v1  ;;  %1742 = vmatprep.subr.bf16.mxu0 %v2240_v6 }
  0x58   :  { %v286_v11 = vld [vmem:[#allocation8 + $0x320] sm:$0xff]  ;;  %1743 = vmatpush2.bf16.msra.mxu0 %v2239_v16 }
  0x59   :  { %v410_v14 = vld [vmem:[#allocation8 + $0x700] sm:$0xff]  ;;  %v2232_v20 = vcombine.high %v282_v10, %v286_v11  ;;  %1783 = vmatprep.subr.bf16.mxu1 %v2368_v9  ;;  %v2231_v32 = vcombine.low %v282_v10, %v286_v11 }
  0x5a   :  { %v414_v15 = vld [vmem:[#allocation8 + $0x720] sm:$0xff]  ;;  %1784 = vmatpush2.bf16.msra.mxu1 %v2367_v17  ;;  %v131_v17 = vmul.f32 %v130_v51, %v128_v7  ;;  %v215_v7 = vld [vmem:[#allocation8 + $0xe8] sm:$0xff] }
  0x5b   :  { %v2651_v18 = vld [vmem:[#allocation8 + $0x2c0] sm:$0xff]  ;;  %v2360_v27 = vcombine.high %v410_v14, %v414_v15  ;;  %v2359_v33 = vcombine.low %v410_v14, %v414_v15  ;;  %1744 = vmatprep.subr.bf16.mxu0 %v2232_v20  ;;  %v82_v15 = vadd.f32 %v80_v61, %v74_v60  ;;  %v219_v61 = vld [vmem:[#allocation8 + $0x108] sm:$0xff] }
  0x5c   :  { %v278_v21 = vld [vmem:[#allocation8 + $0x2e0] sm:$0xff]  ;;  %1745 = vmatpush2.bf16.msra.mxu0 %v2231_v32  ;;  %v243_v32 = vld [vmem:[#allocation8 + $0x1c8] sm:$0xff] }
  0x5d   :  { %v59_v22 = vld [vmem:[%s2716_s2] sm:$0x1]  ;;  %v111_v28 = vld [vmem:[%s2716_s2 + $0x6] sm:$0x1]  ;;  %v2224_v36 = vcombine.high %v2651_v18, %v278_v21  ;;  %v68_v41 = vld [vmem:[%s2716_s2 + $0x1] sm:$0x1]  ;;  %1785 = vmatprep.subr.bf16.mxu1 %v2360_v27  ;;  %v2223_v52 = vcombine.low %v2651_v18, %v278_v21  ;;  %v134_v18 = vadd.f32 %v132_v5, %v126_v3 }
  0x5e   :  { %v402_v34 = vld [vmem:[#allocation8 + $0x6c0] sm:$0xff]  ;;  %v62_v39 = vmul.f32 %v61_v8, %v59_v22  ;;  %v114_v45 = vmul.f32 %v113_v13, %v111_v28  ;;  %v71_v57 = vmul.f32 %v70_v25, %v68_v41  ;;  %1786 = vmatpush2.bf16.msra.mxu1 %v2359_v33  ;;  %v163_v26 = vrot.slane %v82_v15, 7  ;;  %v247_v33 = vld [vmem:[#allocation8 + $0x1e8] sm:$0xff] }
  0x5f   :  { %v406_v35 = vld [vmem:[#allocation8 + $0x6e0] sm:$0xff]  ;;  %1746 = vmatprep.subr.bf16.mxu0 %v2224_v36  ;;  %v174_v30 = vrot.slane %v134_v18, 7  ;;  %v2194_v40 = vcombine.high %v243_v32, %v247_v33  ;;  %v2193_v48 = vcombine.low %v243_v32, %v247_v33  ;;  %v207_v15 = vld [vmem:[#allocation8 + $0xa8] sm:$0xff] }
  0x60   :  { %v266_v37 = vld [vmem:[#allocation8 + $0x280] sm:$0xff]  ;;  %v2352_v49 = vcombine.high %v402_v34, %v406_v35  ;;  %v2351_v53 = vcombine.low %v402_v34, %v406_v35  ;;  %v65_v58 = vadd.f32 %v64_v23, %v62_v39  ;;  %v117_v2 = vadd.f32 %v116_v29, %v114_v45  ;;  %1747 = vmatpush2.bf16.msra.mxu0 %v2223_v52  ;;  %v371_v34 = vld [vmem:[#allocation8 + $0x5c8] sm:$0xff] }
  0x61   :  { %v270_v38 = vld [vmem:[#allocation8 + $0x2a0] sm:$0xff]  ;;  %v375_v35 = vld [vmem:[#allocation8 + $0x5e8] sm:$0xff] }
  0x62   :  { %v120_v47 = vld [vmem:[%s2716_s2 + $0x7] sm:$0x1]  ;;  %v2216_v54 = vcombine.high %v266_v37, %v270_v38  ;;  %v76_v1 = vld [vmem:[%s2716_s2 + $0x2] sm:$0x1]  ;;  %1787 = vmatprep.subr.bf16.mxu1 %v2352_v49  ;;  %v2215_v8 = vcombine.low %v266_v37, %v270_v38  ;;  %v73_v13 = vadd.f32 %v71_v57, %v65_v58  ;;  %v2322_v41 = vcombine.high %v371_v34, %v375_v35  ;;  %v363_v45 = vld [vmem:[#allocation8 + $0x588] sm:$0xff]  ;;  %s2492_s2 = smov [#allocation9]  }
  0x63   :  { %v394_v55 = vld [vmem:[#allocation8 + $0x680] sm:$0xff]  ;;  %v123_v62 = vmul.f32 %v122_v31, %v120_v47  ;;  %v79_v14 = vmul.f32 %v78_v44, %v76_v1  ;;  %1788 = vmatpush2.bf16.msra.mxu1 %v2351_v53  ;;  %v2321_v49 = vcombine.low %v371_v34, %v375_v35  ;;  %v2314_v51 = vcombine.high %v363_v45, %v367_v46  ;;  %v227_v52 = vld [vmem:[#allocation8 + $0x148] sm:$0xff]  ;;  %s2110_s9 = sshll.u32 %s2492_s2, 4  ;;  %s2111_s9 = int_to_ptr.vmem [resolvable:$true] %s2110_s9 }
  0x64   :  { %v398_v56 = vld [vmem:[#allocation8 + $0x6a0] sm:$0xff]  ;;  %1748 = vmatprep.subr.bf16.mxu0 %v2216_v54  ;;  %v231_v53 = vld [vmem:[#allocation8 + $0x168] sm:$0xff]  ;;  %v2313_v57 = vcombine.low %v363_v45, %v367_v46  ;;  %s2459_s10 = scalar_lea.vmem %s2111_s9, 32  ;;  %p2464_p2 = scmp.lt.s32.totalorder %s2111_s9, %s2111_s9 }
  0x65   :  { %v258_v63 = vld [vmem:[#allocation8 + $0x240] sm:$0xff]  ;;  %v2344_v6 = vcombine.high %v394_v55, %v398_v56  ;;  %v2343_v9 = vcombine.low %v394_v55, %v398_v56  ;;  %v125_v16 = vadd.f32 %v123_v62, %v117_v2  ;;  %1749 = vmatpush2.bf16.msra.mxu0 %v2215_v8  ;;  %v81_v25 = vadd.f32 %v79_v14, %v73_v13  ;;  %v355_v54 = vld [vmem:[#allocation8 + $0x548] sm:$0xff]  ;;  %p2460_p1 = scmp.ne.s32.totalorder %s2111_s9, %s2459_s10  ;;  %p2465_p3 = scmp.lt.s32.totalorder %s2459_s10, %s2459_s10 }
  0x66   :  { %v262_v0 = vld [vmem:[#allocation8 + $0x260] sm:$0xff]  ;;  %v359_v55 = vld [vmem:[#allocation8 + $0x568] sm:$0xff]  ;;  %v2185_v56 = vcombine.low %v235_v42, %v239_v43  ;;  %v2178_v58 = vcombine.high %v227_v52, %v231_v53  ;;  %v2177_v1 = vcombine.low %v227_v52, %v231_v53 }
  0x67   :  { %v386_v10 = vld [vmem:[#allocation8 + $0x640] sm:$0xff]  ;;  %v2208_v12 = vcombine.high %v258_v63, %v262_v0  ;;  %1789 = vmatprep.subr.bf16.mxu1 %v2344_v6  ;;  %v2207_v24 = vcombine.low %v258_v63, %v262_v0  ;;  %v133_v29 = vadd.f32 %v131_v17, %v125_v16  ;;  %v165_v37 = vsel %vm164_vm0, %v163_v26, %v81_v25  ;;  %v223_v62 = vld [vmem:[#allocation8 + $0x128] sm:$0xff]  ;;  %p2466_p4 = por %p2465_p3, %p2464_p2 }
  0x68   :  { %v390_v11 = vld [vmem:[#allocation8 + $0x660] sm:$0xff]  ;;  %1790 = vmatpush2.bf16.msra.mxu1 %v2343_v9  ;;  %v2693_v44 = vpack.c.bf16 %v165_v37, %v165_v37  ;;  %v2306_v60 = vcombine.high %v355_v54, %v359_v55  ;;  %v347_v63 = vld [vmem:[#allocation8 + $0x508] sm:$0xff]  ;;  %v2305_v2 = vcombine.low %v355_v54, %v359_v55  ;;  %v2170_v3 = vcombine.high %v219_v61, %v223_v62 }
  0x69   :  { %v2336_v19 = vcombine.high %v386_v10, %v390_v11  ;;  %v250_v20 = vld [vmem:[#allocation8 + $0x200] sm:$0xff]  ;;  %1750 = vmatprep.subr.bf16.mxu0 %v2208_v12  ;;  %v2335_v27 = vcombine.low %v386_v10, %v390_v11  ;;  %v175_v39 = vsel %vm164_vm0, %v174_v30, %v133_v29  ;;  %v351_v0 = vld [vmem:[#allocation8 + $0x528] sm:$0xff]  ;;  %v2169_v10 = vcombine.low %v219_v61, %v223_v62  ;;  %p2467_p5 = pnand %p2466_p4, %p2460_p1 }
  0x6a   :  { %v254_v21 = vld [vmem:[#allocation8 + $0x220] sm:$0xff]  ;;  %1751 = vmatpush2.bf16.msra.mxu0 %v2207_v24  ;;  %v2695_v47 = vpack.c.bf16 %v175_v39, %v175_v39  ;;  %v2298_v5 = vcombine.high %v347_v63, %v351_v0  ;;  %v211_v6 = vld [vmem:[#allocation8 + $0xc8] sm:$0xff]  ;;  %v2297_v11 = vcombine.low %v347_v63, %v351_v0 }
  0x6b   :  { %v378_v22 = vld [vmem:[#allocation8 + $0x600] sm:$0xff]  ;;  %v2200_v28 = vcombine.high %v250_v20, %v254_v21  ;;  %1791 = vmatprep.subr.bf16.mxu1 %v2336_v19  ;;  %v2199_v36 = vcombine.low %v250_v20, %v254_v21  ;;  %v339_v8 = vld [vmem:[#allocation8 + $0x4c8] sm:$0xff]  ;;  %v2162_v12 = vcombine.high %v211_v6, %v215_v7  ;;  %v2161_v18 = vcombine.low %v211_v6, %v215_v7 }
  0x6c   :  { %v382_v23 = vld [vmem:[#allocation8 + $0x620] sm:$0xff]  ;;  %1792 = vmatpush2.bf16.msra.mxu1 %v2335_v27  ;;  %v343_v9 = vld [vmem:[#allocation8 + $0x4e8] sm:$0xff] }
  0x6d   :  { %v2328_v31 = vcombine.high %v378_v22, %v382_v23  ;;  %1752 = vmatprep.subr.bf16.mxu0 %v2200_v28  ;;  %v2327_v38 = vcombine.low %v378_v22, %v382_v23  ;;  %v2290_v13 = vcombine.high %v339_v8, %v343_v9  ;;  %v203_v14 = vld [vmem:[#allocation8 + $0x88] sm:$0xff]  ;;  %v2289_v19 = vcombine.low %v339_v8, %v343_v9 }
  0x6e   :  { %1753 = vmatpush2.bf16.msra.mxu0 %v2199_v36  ;;  %v331_v16 = vld [vmem:[#allocation8 + $0x488] sm:$0xff]  ;;  %v2154_v20 = vcombine.high %v203_v14, %v207_v15  ;;  %v2153_v26 = vcombine.low %v203_v14, %v207_v15 }
  0x6f   :  { %1793 = vmatprep.subr.bf16.mxu1 %v2328_v31  ;;  %1804 = vmatprep.subr.bf16.mxu0 %v2194_v40  ;;  %v335_v17 = vld [vmem:[#allocation8 + $0x4a8] sm:$0xff] }
  0x70   :  { %1794 = vmatpush2.bf16.msra.mxu1 %v2327_v38  ;;  %v2282_v21 = vcombine.high %v331_v16, %v335_v17  ;;  %v195_v22 = vld [vmem:[#allocation8 + $0x48] sm:$0xff]  ;;  %v2281_v27 = vcombine.low %v331_v16, %v335_v17 }
  0x71   :  { %1845 = vmatprep.subr.bf16.mxu1 %v2322_v41  ;;  %1755 = vmatmul.mubr.bf16.vlgmr.msra.gmra.mxu0 %v2693_v44  ;;  %v199_v23 = vld [vmem:[#allocation8 + $0x68] sm:$0xff] }
  0x72   :  { %1805 = vmatpush1.bf16.msra.mxu0 %v2193_v48  ;;  %1836 = vmatprep.mubr.bf16.mxu0 %v2628_v59  ;;  %v323_v24 = vld [vmem:[#allocation8 + $0x448] sm:$0xff]  ;;  %v2146_v28 = vcombine.high %v195_v22, %v199_v23  ;;  %v2145_v34 = vcombine.low %v195_v22, %v199_v23 }
  0x73   :  { %1796 = vmatmul.mubr.bf16.vlgmr.msra.gmra.mxu1 %v2695_v47  ;;  %1806 = vmatprep.subr.bf16.mxu0 %v2186_v50  ;;  %v327_v25 = vld [vmem:[#allocation8 + $0x468] sm:$0xff] }
  0x74   :  { %1846 = vmatpush1.bf16.msra.mxu1 %v2321_v49  ;;  %1877 = vmatprep.mubr.bf16.mxu1 %v2636_v4  ;;  %v2274_v29 = vcombine.high %v323_v24, %v327_v25  ;;  %v187_v30 = vld [vmem:[#allocation8 + $0x8] sm:$0xff]  ;;  %v2273_v35 = vcombine.low %v323_v24, %v327_v25 }
  0x75   :  { %1847 = vmatprep.subr.bf16.mxu1 %v2314_v51  ;;  %v191_v31 = vld [vmem:[#allocation8 + $0x28] sm:$0xff] }
  0x76   :  { %1807 = vmatpush1.bf16.msra.mxu0 %v2185_v56  ;;  %v315_v32 = vld [vmem:[#allocation8 + $0x408] sm:$0xff]  ;;  %v2138_v36 = vcombine.high %v187_v30, %v191_v31  ;;  %v2137_v42 = vcombine.low %v187_v30, %v191_v31 }
  0x77   :  { %1808 = vmatprep.subr.bf16.mxu0 %v2178_v58  ;;  %v319_v33 = vld [vmem:[#allocation8 + $0x428] sm:$0xff] }
  0x78   :  { %1848 = vmatpush1.bf16.msra.mxu1 %v2313_v57  ;;  %v2266_v37 = vcombine.high %v315_v32, %v319_v33  ;;  %v307_v38 = vld [vmem:[#allocation8 + $0x3c8] sm:$0xff]  ;;  %v2265_v43 = vcombine.low %v315_v32, %v319_v33 }
  0x79   :  { %1849 = vmatprep.subr.bf16.mxu1 %v2306_v60  ;;  %v311_v39 = vld [vmem:[#allocation8 + $0x3e8] sm:$0xff] }
  0x7a   :  { %1809 = vmatpush1.bf16.msra.mxu0 %v2177_v1  ;;  %v435_v40 = vld [vmem:[#allocation8 + $0x7c8] sm:$0xff]  ;;  %v2258_v45 = vcombine.high %v307_v38, %v311_v39  ;;  %v2257_v52 = vcombine.low %v307_v38, %v311_v39 }
  0x7b   :  { %1810 = vmatprep.subr.bf16.mxu0 %v2170_v3  ;;  %v439_v41 = vld [vmem:[#allocation8 + $0x7e8] sm:$0xff] }
  0x7c   :  { %1850 = vmatpush1.bf16.msra.mxu1 %v2305_v2  ;;  %v2386_v46 = vcombine.high %v435_v40, %v439_v41  ;;  %v299_v48 = vld [vmem:[#allocation8 + $0x388] sm:$0xff]  ;;  %v2385_v53 = vcombine.low %v435_v40, %v439_v41 }
  0x7d   :  { %1851 = vmatprep.subr.bf16.mxu1 %v2298_v5  ;;  %v303_v49 = vld [vmem:[#allocation8 + $0x3a8] sm:$0xff] }
  0x7e   :  { %1811 = vmatpush1.bf16.msra.mxu0 %v2169_v10  ;;  %v427_v50 = vld [vmem:[#allocation8 + $0x788] sm:$0xff]  ;;  %v2250_v54 = vcombine.high %v299_v48, %v303_v49  ;;  %v2249_v61 = vcombine.low %v299_v48, %v303_v49 }
  0x7f   :  { %1812 = vmatprep.subr.bf16.mxu0 %v2162_v12  ;;  %v431_v51 = vld [vmem:[#allocation8 + $0x7a8] sm:$0xff] }
  0x80   :  { %1852 = vmatpush1.bf16.msra.mxu1 %v2297_v11  ;;  %v2378_v55 = vcombine.high %v427_v50, %v431_v51  ;;  %v291_v56 = vld [vmem:[#allocation8 + $0x348] sm:$0xff]  ;;  %v2377_v62 = vcombine.low %v427_v50, %v431_v51 }
  0x81   :  { %1853 = vmatprep.subr.bf16.mxu1 %v2290_v13  ;;  %v295_v57 = vld [vmem:[#allocation8 + $0x368] sm:$0xff] }
  0x82   :  { %1813 = vmatpush1.bf16.msra.mxu0 %v2161_v18  ;;  %v419_v58 = vld [vmem:[#allocation8 + $0x748] sm:$0xff]  ;;  %v2242_v63 = vcombine.high %v291_v56, %v295_v57  ;;  %v2241_v6 = vcombine.low %v291_v56, %v295_v57 }
  0x83   :  { %1814 = vmatprep.subr.bf16.mxu0 %v2154_v20  ;;  %v423_v60 = vld [vmem:[#allocation8 + $0x768] sm:$0xff] }
  0x84   :  { %1854 = vmatpush1.bf16.msra.mxu1 %v2289_v19  ;;  %v2370_v0 = vcombine.high %v419_v58, %v423_v60  ;;  %v283_v1 = vld [vmem:[#allocation8 + $0x308] sm:$0xff]  ;;  %v2369_v7 = vcombine.low %v419_v58, %v423_v60 }
  0x85   :  { %1855 = vmatprep.subr.bf16.mxu1 %v2282_v21  ;;  %v287_v2 = vld [vmem:[#allocation8 + $0x328] sm:$0xff] }
  0x86   :  { %1815 = vmatpush1.bf16.msra.mxu0 %v2153_v26  ;;  %v411_v3 = vld [vmem:[#allocation8 + $0x708] sm:$0xff]  ;;  %v2234_v8 = vcombine.high %v283_v1, %v287_v2  ;;  %v2233_v14 = vcombine.low %v283_v1, %v287_v2 }
  0x87   :  { %1816 = vmatprep.subr.bf16.mxu0 %v2146_v28  ;;  %v415_v5 = vld [vmem:[#allocation8 + $0x728] sm:$0xff] }
  0x88   :  { %1856 = vmatpush1.bf16.msra.mxu1 %v2281_v27  ;;  %v2362_v9 = vcombine.high %v411_v3, %v415_v5  ;;  %v275_v10 = vld [vmem:[#allocation8 + $0x2c8] sm:$0xff]  ;;  %v2361_v15 = vcombine.low %v411_v3, %v415_v5 }
  0x89   :  { %1857 = vmatprep.subr.bf16.mxu1 %v2274_v29  ;;  %v279_v11 = vld [vmem:[#allocation8 + $0x2e8] sm:$0xff] }
  0x8a   :  { %1817 = vmatpush1.bf16.msra.mxu0 %v2145_v34  ;;  %v403_v12 = vld [vmem:[#allocation8 + $0x6c8] sm:$0xff]  ;;  %v2226_v16 = vcombine.high %v275_v10, %v279_v11  ;;  %v2225_v22 = vcombine.low %v275_v10, %v279_v11 }
  0x8b   :  { %1818 = vmatprep.subr.bf16.mxu0 %v2138_v36  ;;  %v407_v13 = vld [vmem:[#allocation8 + $0x6e8] sm:$0xff] }
  0x8c   :  { %1858 = vmatpush1.bf16.msra.mxu1 %v2273_v35  ;;  %v2354_v17 = vcombine.high %v403_v12, %v407_v13  ;;  %v267_v18 = vld [vmem:[#allocation8 + $0x288] sm:$0xff]  ;;  %v2353_v23 = vcombine.low %v403_v12, %v407_v13 }
  0x8d   :  { %1859 = vmatprep.subr.bf16.mxu1 %v2266_v37  ;;  %v271_v19 = vld [vmem:[#allocation8 + $0x2a8] sm:$0xff] }
  0x8e   :  { %1819 = vmatpush1.bf16.msra.mxu0 %v2137_v42  ;;  %v395_v20 = vld [vmem:[#allocation8 + $0x688] sm:$0xff]  ;;  %v2218_v24 = vcombine.high %v267_v18, %v271_v19  ;;  %v2217_v30 = vcombine.low %v267_v18, %v271_v19  ;;  %v244_v42 = vld [vmem:[#allocation8 + $0x1d0] sm:$0xff] }
  0x8f   :  { %1820 = vmatprep.subr.bf16.mxu0 %v2258_v45  ;;  %v399_v21 = vld [vmem:[#allocation8 + $0x6a8] sm:$0xff]  ;;  %v372_v45 = vld [vmem:[#allocation8 + $0x5d0] sm:$0xff] }
  0x90   :  { %1860 = vmatpush1.bf16.msra.mxu1 %v2265_v43  ;;  %v2346_v25 = vcombine.high %v395_v20, %v399_v21  ;;  %v259_v26 = vld [vmem:[#allocation8 + $0x248] sm:$0xff]  ;;  %v2345_v31 = vcombine.low %v395_v20, %v399_v21  ;;  %v248_v43 = vld [vmem:[#allocation8 + $0x1f0] sm:$0xff] }
  0x91   :  { %1861 = vmatprep.subr.bf16.mxu1 %v2386_v46  ;;  %v263_v27 = vld [vmem:[#allocation8 + $0x268] sm:$0xff]  ;;  %v376_v46 = vld [vmem:[#allocation8 + $0x5f0] sm:$0xff]  ;;  %v2196_v50 = vcombine.high %v244_v42, %v248_v43  ;;  %v2195_v56 = vcombine.low %v244_v42, %v248_v43 }
  0x92   :  { %1821 = vmatpush2.bf16.msra.mxu0 %v2257_v52  ;;  %v387_v28 = vld [vmem:[#allocation8 + $0x648] sm:$0xff]  ;;  %v2210_v32 = vcombine.high %v259_v26, %v263_v27  ;;  %v2209_v38 = vcombine.low %v259_v26, %v263_v27  ;;  %v2324_v51 = vcombine.high %v372_v45, %v376_v46  ;;  %v236_v52 = vld [vmem:[#allocation8 + $0x190] sm:$0xff]  ;;  %v2323_v57 = vcombine.low %v372_v45, %v376_v46 }
  0x93   :  { %1822 = vmatprep.subr.bf16.mxu0 %v2250_v54  ;;  %v391_v29 = vld [vmem:[#allocation8 + $0x668] sm:$0xff]  ;;  %v364_v54 = vld [vmem:[#allocation8 + $0x590] sm:$0xff] }
  0x94   :  { %1862 = vmatpush2.bf16.msra.mxu1 %v2385_v53  ;;  %v2338_v33 = vcombine.high %v387_v28, %v391_v29  ;;  %v251_v34 = vld [vmem:[#allocation8 + $0x208] sm:$0xff]  ;;  %v2337_v39 = vcombine.low %v387_v28, %v391_v29  ;;  %v240_v53 = vld [vmem:[#allocation8 + $0x1b0] sm:$0xff] }
  0x95   :  { %1863 = vmatprep.subr.bf16.mxu1 %v2378_v55  ;;  %v255_v35 = vld [vmem:[#allocation8 + $0x228] sm:$0xff]  ;;  %v368_v55 = vld [vmem:[#allocation8 + $0x5b0] sm:$0xff]  ;;  %v2188_v58 = vcombine.high %v236_v52, %v240_v53  ;;  %v2187_v1 = vcombine.low %v236_v52, %v240_v53 }
  0x96   :  { %1823 = vmatpush2.bf16.msra.mxu0 %v2249_v61  ;;  %v379_v36 = vld [vmem:[#allocation8 + $0x608] sm:$0xff]  ;;  %v2202_v40 = vcombine.high %v251_v34, %v255_v35  ;;  %v2201_v48 = vcombine.low %v251_v34, %v255_v35  ;;  %v2316_v60 = vcombine.high %v364_v54, %v368_v55  ;;  %v228_v61 = vld [vmem:[#allocation8 + $0x150] sm:$0xff]  ;;  %v2315_v2 = vcombine.low %v364_v54, %v368_v55 }
  0x97   :  { %1824 = vmatprep.subr.bf16.mxu0 %v2242_v63  ;;  %v383_v37 = vld [vmem:[#allocation8 + $0x628] sm:$0xff]  ;;  %v356_v63 = vld [vmem:[#allocation8 + $0x550] sm:$0xff] }
  0x98   :  { %1864 = vmatpush2.bf16.msra.mxu1 %v2377_v62  ;;  %v2330_v41 = vcombine.high %v379_v36, %v383_v37  ;;  %v2329_v49 = vcombine.low %v379_v36, %v383_v37  ;;  %v232_v62 = vld [vmem:[#allocation8 + $0x170] sm:$0xff] }
  0x99   :  { %1865 = vmatprep.subr.bf16.mxu1 %v2370_v0  ;;  %v360_v0 = vld [vmem:[#allocation8 + $0x570] sm:$0xff]  ;;  %v2180_v3 = vcombine.high %v228_v61, %v232_v62  ;;  %v2179_v10 = vcombine.low %v228_v61, %v232_v62 }
  0x9a   :  { %1825 = vmatpush2.bf16.msra.mxu0 %v2241_v6  ;;  %v2308_v5 = vcombine.high %v356_v63, %v360_v0  ;;  %v220_v6 = vld [vmem:[#allocation8 + $0x110] sm:$0xff]  ;;  %v2307_v11 = vcombine.low %v356_v63, %v360_v0 }
  0x9b   :  { %1826 = vmatprep.subr.bf16.mxu0 %v2234_v8  ;;  %v348_v8 = vld [vmem:[#allocation8 + $0x510] sm:$0xff] }
  0x9c   :  { %1866 = vmatpush2.bf16.msra.mxu1 %v2369_v7  ;;  %v224_v7 = vld [vmem:[#allocation8 + $0x130] sm:$0xff] }
  0x9d   :  { %1867 = vmatprep.subr.bf16.mxu1 %v2362_v9  ;;  %v352_v9 = vld [vmem:[#allocation8 + $0x530] sm:$0xff]  ;;  %v2172_v12 = vcombine.high %v220_v6, %v224_v7  ;;  %v2171_v18 = vcombine.low %v220_v6, %v224_v7 }
  0x9e   :  { %1827 = vmatpush2.bf16.msra.mxu0 %v2233_v14  ;;  %v2300_v13 = vcombine.high %v348_v8, %v352_v9  ;;  %v212_v14 = vld [vmem:[#allocation8 + $0xd0] sm:$0xff]  ;;  %v2299_v19 = vcombine.low %v348_v8, %v352_v9 }
  0x9f   :  { %1828 = vmatprep.subr.bf16.mxu0 %v2226_v16  ;;  %v340_v16 = vld [vmem:[#allocation8 + $0x4d0] sm:$0xff] }
  0xa0   :  { %1868 = vmatpush2.bf16.msra.mxu1 %v2361_v15  ;;  %v216_v15 = vld [vmem:[#allocation8 + $0xf0] sm:$0xff] }
  0xa1   :  { %1869 = vmatprep.subr.bf16.mxu1 %v2354_v17  ;;  %v344_v17 = vld [vmem:[#allocation8 + $0x4f0] sm:$0xff]  ;;  %v2164_v20 = vcombine.high %v212_v14, %v216_v15  ;;  %v2163_v26 = vcombine.low %v212_v14, %v216_v15 }
  0xa2   :  { %1829 = vmatpush2.bf16.msra.mxu0 %v2225_v22  ;;  %v2292_v21 = vcombine.high %v340_v16, %v344_v17  ;;  %v204_v22 = vld [vmem:[#allocation8 + $0x90] sm:$0xff]  ;;  %v2291_v27 = vcombine.low %v340_v16, %v344_v17 }
  0xa3   :  { %1830 = vmatprep.subr.bf16.mxu0 %v2218_v24  ;;  %v332_v24 = vld [vmem:[#allocation8 + $0x490] sm:$0xff] }
  0xa4   :  { %1870 = vmatpush2.bf16.msra.mxu1 %v2353_v23  ;;  %v208_v23 = vld [vmem:[#allocation8 + $0xb0] sm:$0xff] }
  0xa5   :  { %1871 = vmatprep.subr.bf16.mxu1 %v2346_v25  ;;  %v336_v25 = vld [vmem:[#allocation8 + $0x4b0] sm:$0xff]  ;;  %v2156_v28 = vcombine.high %v204_v22, %v208_v23  ;;  %v2155_v34 = vcombine.low %v204_v22, %v208_v23 }
  0xa6   :  { %1831 = vmatpush2.bf16.msra.mxu0 %v2217_v30  ;;  %v2284_v29 = vcombine.high %v332_v24, %v336_v25  ;;  %v196_v30 = vld [vmem:[#allocation8 + $0x50] sm:$0xff]  ;;  %v2283_v35 = vcombine.low %v332_v24, %v336_v25 }
  0xa7   :  { %1832 = vmatprep.subr.bf16.mxu0 %v2210_v32  ;;  %v324_v32 = vld [vmem:[#allocation8 + $0x450] sm:$0xff] }
  0xa8   :  { %1872 = vmatpush2.bf16.msra.mxu1 %v2345_v31  ;;  %v200_v31 = vld [vmem:[#allocation8 + $0x70] sm:$0xff] }
  0xa9   :  { %1873 = vmatprep.subr.bf16.mxu1 %v2338_v33  ;;  %v328_v33 = vld [vmem:[#allocation8 + $0x470] sm:$0xff]  ;;  %v2148_v36 = vcombine.high %v196_v30, %v200_v31  ;;  %v2147_v42 = vcombine.low %v196_v30, %v200_v31 }
  0xaa   :  { %1833 = vmatpush2.bf16.msra.mxu0 %v2209_v38  ;;  %v2276_v37 = vcombine.high %v324_v32, %v328_v33  ;;  %v188_v38 = vld [vmem:[#allocation8 + $0x10] sm:$0xff]  ;;  %v2275_v43 = vcombine.low %v324_v32, %v328_v33 }
  0xab   :  { %1834 = vmatprep.subr.bf16.mxu0 %v2202_v40  ;;  %v316_v40 = vld [vmem:[#allocation8 + $0x410] sm:$0xff] }
  0xac   :  { %1874 = vmatpush2.bf16.msra.mxu1 %v2337_v39  ;;  %v192_v39 = vld [vmem:[#allocation8 + $0x30] sm:$0xff] }
  0xad   :  { %1875 = vmatprep.subr.bf16.mxu1 %v2330_v41  ;;  %v320_v41 = vld [vmem:[#allocation8 + $0x430] sm:$0xff]  ;;  %v2140_v45 = vcombine.high %v188_v38, %v192_v39  ;;  %v2139_v52 = vcombine.low %v188_v38, %v192_v39 }
  0xae   :  { %1835 = vmatpush2.bf16.msra.mxu0 %v2201_v48  ;;  %v2268_v46 = vcombine.high %v316_v40, %v320_v41  ;;  %v308_v48 = vld [vmem:[#allocation8 + $0x3d0] sm:$0xff]  ;;  %v2267_v53 = vcombine.low %v316_v40, %v320_v41 }
  0xaf   :  { %1886 = vmatprep.subr.bf16.mxu0 %v2196_v50  ;;  %v436_v50 = vld [vmem:[#allocation8 + $0x7d0] sm:$0xff] }
  0xb0   :  { %1876 = vmatpush2.bf16.msra.mxu1 %v2329_v49  ;;  %v312_v49 = vld [vmem:[#allocation8 + $0x3f0] sm:$0xff] }
  0xb1   :  { %1927 = vmatprep.subr.bf16.mxu1 %v2324_v51  ;;  %1837 = vmatmul.mubr.bf16.vlgmr.msra.gmra.mxu0 %v2693_v44  ;;  %v440_v51 = vld [vmem:[#allocation8 + $0x7f0] sm:$0xff]  ;;  %v2260_v54 = vcombine.high %v308_v48, %v312_v49  ;;  %v2259_v61 = vcombine.low %v308_v48, %v312_v49 }
  0xb2   :  { %1887 = vmatpush1.bf16.msra.mxu0 %v2195_v56  ;;  %1918 = vmatprep.mubr.bf16.mxu0 %v2628_v59  ;;  %v2388_v55 = vcombine.high %v436_v50, %v440_v51  ;;  %v300_v56 = vld [vmem:[#allocation8 + $0x390] sm:$0xff]  ;;  %v2387_v62 = vcombine.low %v436_v50, %v440_v51 }
  0xb3   :  { %1878 = vmatmul.mubr.bf16.vlgmr.msra.gmra.mxu1 %v2695_v47  ;;  %1888 = vmatprep.subr.bf16.mxu0 %v2188_v58  ;;  %v428_v58 = vld [vmem:[#allocation8 + $0x790] sm:$0xff] }
  0xb4   :  { %1928 = vmatpush1.bf16.msra.mxu1 %v2323_v57  ;;  %1959 = vmatprep.mubr.bf16.mxu1 %v2636_v4  ;;  %v304_v57 = vld [vmem:[#allocation8 + $0x3b0] sm:$0xff] }
  0xb5   :  { %1929 = vmatprep.subr.bf16.mxu1 %v2316_v60  ;;  %v432_v60 = vld [vmem:[#allocation8 + $0x7b0] sm:$0xff]  ;;  %v2252_v63 = vcombine.high %v300_v56, %v304_v57  ;;  %v2251_v6 = vcombine.low %v300_v56, %v304_v57 }
  0xb6   :  { %1889 = vmatpush1.bf16.msra.mxu0 %v2187_v1  ;;  %v2380_v0 = vcombine.high %v428_v58, %v432_v60  ;;  %v292_v1 = vld [vmem:[#allocation8 + $0x350] sm:$0xff]  ;;  %v2379_v7 = vcombine.low %v428_v58, %v432_v60 }
  0xb7   :  { %1890 = vmatprep.subr.bf16.mxu0 %v2180_v3  ;;  %v420_v3 = vld [vmem:[#allocation8 + $0x750] sm:$0xff] }
  0xb8   :  { %1930 = vmatpush1.bf16.msra.mxu1 %v2315_v2  ;;  %v296_v2 = vld [vmem:[#allocation8 + $0x370] sm:$0xff] }
  0xb9   :  { %1931 = vmatprep.subr.bf16.mxu1 %v2308_v5  ;;  %v424_v5 = vld [vmem:[#allocation8 + $0x770] sm:$0xff]  ;;  %v2244_v8 = vcombine.high %v292_v1, %v296_v2  ;;  %v2243_v14 = vcombine.low %v292_v1, %v296_v2 }
  0xba   :  { %1891 = vmatpush1.bf16.msra.mxu0 %v2179_v10  ;;  %v2372_v9 = vcombine.high %v420_v3, %v424_v5  ;;  %v284_v10 = vld [vmem:[#allocation8 + $0x310] sm:$0xff]  ;;  %v2371_v15 = vcombine.low %v420_v3, %v424_v5 }
  0xbb   :  { %1892 = vmatprep.subr.bf16.mxu0 %v2172_v12  ;;  %v412_v12 = vld [vmem:[#allocation8 + $0x710] sm:$0xff] }
  0xbc   :  { %1932 = vmatpush1.bf16.msra.mxu1 %v2307_v11  ;;  %v288_v11 = vld [vmem:[#allocation8 + $0x330] sm:$0xff] }
  0xbd   :  { %1933 = vmatprep.subr.bf16.mxu1 %v2300_v13  ;;  %v416_v13 = vld [vmem:[#allocation8 + $0x730] sm:$0xff]  ;;  %v2236_v16 = vcombine.high %v284_v10, %v288_v11  ;;  %v2235_v22 = vcombine.low %v284_v10, %v288_v11 }
  0xbe   :  { %1893 = vmatpush1.bf16.msra.mxu0 %v2171_v18  ;;  %v2364_v17 = vcombine.high %v412_v12, %v416_v13  ;;  %v276_v18 = vld [vmem:[#allocation8 + $0x2d0] sm:$0xff]  ;;  %v2363_v23 = vcombine.low %v412_v12, %v416_v13 }
  0xbf   :  { %1894 = vmatprep.subr.bf16.mxu0 %v2164_v20  ;;  %v404_v20 = vld [vmem:[#allocation8 + $0x6d0] sm:$0xff] }
  0xc0   :  { %1934 = vmatpush1.bf16.msra.mxu1 %v2299_v19  ;;  %v280_v19 = vld [vmem:[#allocation8 + $0x2f0] sm:$0xff] }
  0xc1   :  { %1935 = vmatprep.subr.bf16.mxu1 %v2292_v21  ;;  %v408_v21 = vld [vmem:[#allocation8 + $0x6f0] sm:$0xff]  ;;  %v2228_v24 = vcombine.high %v276_v18, %v280_v19  ;;  %v2227_v30 = vcombine.low %v276_v18, %v280_v19 }
  0xc2   :  { %1895 = vmatpush1.bf16.msra.mxu0 %v2163_v26  ;;  %v2356_v25 = vcombine.high %v404_v20, %v408_v21  ;;  %v268_v26 = vld [vmem:[#allocation8 + $0x290] sm:$0xff]  ;;  %v2355_v31 = vcombine.low %v404_v20, %v408_v21 }
  0xc3   :  { %1896 = vmatprep.subr.bf16.mxu0 %v2156_v28  ;;  %v396_v28 = vld [vmem:[#allocation8 + $0x690] sm:$0xff] }
  0xc4   :  { %1936 = vmatpush1.bf16.msra.mxu1 %v2291_v27  ;;  %v272_v27 = vld [vmem:[#allocation8 + $0x2b0] sm:$0xff] }
  0xc5   :  { %1937 = vmatprep.subr.bf16.mxu1 %v2284_v29  ;;  %v400_v29 = vld [vmem:[#allocation8 + $0x6b0] sm:$0xff]  ;;  %v2220_v32 = vcombine.high %v268_v26, %v272_v27  ;;  %v2219_v38 = vcombine.low %v268_v26, %v272_v27 }
  0xc6   :  { %1897 = vmatpush1.bf16.msra.mxu0 %v2155_v34  ;;  %v2348_v33 = vcombine.high %v396_v28, %v400_v29  ;;  %v260_v34 = vld [vmem:[#allocation8 + $0x250] sm:$0xff]  ;;  %v2347_v39 = vcombine.low %v396_v28, %v400_v29  ;;  %v205_v28 = vld [vmem:[#allocation8 + $0x98] sm:$0xff] }
  0xc7   :  { %1898 = vmatprep.subr.bf16.mxu0 %v2148_v36  ;;  %v388_v36 = vld [vmem:[#allocation8 + $0x650] sm:$0xff]  ;;  %v209_v29 = vld [vmem:[#allocation8 + $0xb8] sm:$0xff] }
  0xc8   :  { %1938 = vmatpush1.bf16.msra.mxu1 %v2283_v35  ;;  %v264_v35 = vld [vmem:[#allocation8 + $0x270] sm:$0xff] }
  0xc9   :  { %1939 = vmatprep.subr.bf16.mxu1 %v2276_v37  ;;  %v392_v37 = vld [vmem:[#allocation8 + $0x670] sm:$0xff]  ;;  %v2212_v40 = vcombine.high %v260_v34, %v264_v35  ;;  %v2211_v48 = vcombine.low %v260_v34, %v264_v35  ;;  %v2158_v34 = vcombine.high %v205_v28, %v209_v29 }
  0xca   :  { %1899 = vmatpush1.bf16.msra.mxu0 %v2147_v42  ;;  %v2340_v41 = vcombine.high %v388_v36, %v392_v37  ;;  %v252_v42 = vld [vmem:[#allocation8 + $0x210] sm:$0xff]  ;;  %v2339_v49 = vcombine.low %v388_v36, %v392_v37  ;;  %v197_v36 = vld [vmem:[#allocation8 + $0x58] sm:$0xff] }
  0xcb   :  { %1900 = vmatprep.subr.bf16.mxu0 %v2140_v45  ;;  %v380_v45 = vld [vmem:[#allocation8 + $0x610] sm:$0xff]  ;;  %v201_v37 = vld [vmem:[#allocation8 + $0x78] sm:$0xff] }
  0xcc   :  { %1940 = vmatpush1.bf16.msra.mxu1 %v2275_v43  ;;  %v256_v43 = vld [vmem:[#allocation8 + $0x230] sm:$0xff] }
  0xcd   :  { %1941 = vmatprep.subr.bf16.mxu1 %v2268_v46  ;;  %v384_v46 = vld [vmem:[#allocation8 + $0x630] sm:$0xff]  ;;  %v2204_v50 = vcombine.high %v252_v42, %v256_v43  ;;  %v2203_v56 = vcombine.low %v252_v42, %v256_v43  ;;  %v2150_v42 = vcombine.high %v197_v36, %v201_v37 }
  0xce   :  { %1901 = vmatpush1.bf16.msra.mxu0 %v2139_v52  ;;  %v2332_v51 = vcombine.high %v380_v45, %v384_v46  ;;  %v245_v52 = vld [vmem:[#allocation8 + $0x1d8] sm:$0xff]  ;;  %v2331_v57 = vcombine.low %v380_v45, %v384_v46 }
  0xcf   :  { %1902 = vmatprep.subr.bf16.mxu0 %v2260_v54  ;;  %v373_v54 = vld [vmem:[#allocation8 + $0x5d8] sm:$0xff] }
  0xd0   :  { %1942 = vmatpush1.bf16.msra.mxu1 %v2267_v53  ;;  %v249_v53 = vld [vmem:[#allocation8 + $0x1f8] sm:$0xff] }
  0xd1   :  { %1943 = vmatprep.subr.bf16.mxu1 %v2388_v55  ;;  %v377_v55 = vld [vmem:[#allocation8 + $0x5f8] sm:$0xff]  ;;  %v2198_v58 = vcombine.high %v245_v52, %v249_v53  ;;  %v2197_v1 = vcombine.low %v245_v52, %v249_v53 }
  0xd2   :  { %1903 = vmatpush2.bf16.msra.mxu0 %v2259_v61  ;;  %v2326_v60 = vcombine.high %v373_v54, %v377_v55  ;;  %v237_v61 = vld [vmem:[#allocation8 + $0x198] sm:$0xff]  ;;  %v2325_v2 = vcombine.low %v373_v54, %v377_v55 }
  0xd3   :  { %1904 = vmatprep.subr.bf16.mxu0 %v2252_v63  ;;  %v365_v63 = vld [vmem:[#allocation8 + $0x598] sm:$0xff] }
  0xd4   :  { %1944 = vmatpush2.bf16.msra.mxu1 %v2387_v62  ;;  %v241_v62 = vld [vmem:[#allocation8 + $0x1b8] sm:$0xff] }
  0xd5   :  { %1945 = vmatprep.subr.bf16.mxu1 %v2380_v0  ;;  %v369_v0 = vld [vmem:[#allocation8 + $0x5b8] sm:$0xff]  ;;  %v2190_v3 = vcombine.high %v237_v61, %v241_v62  ;;  %v2189_v10 = vcombine.low %v237_v61, %v241_v62 }
  0xd6   :  { %1905 = vmatpush2.bf16.msra.mxu0 %v2251_v6  ;;  %v2318_v5 = vcombine.high %v365_v63, %v369_v0  ;;  %v229_v6 = vld [vmem:[#allocation8 + $0x158] sm:$0xff]  ;;  %v2317_v11 = vcombine.low %v365_v63, %v369_v0 }
  0xd7   :  { %1906 = vmatprep.subr.bf16.mxu0 %v2244_v8  ;;  %v357_v8 = vld [vmem:[#allocation8 + $0x558] sm:$0xff] }
  0xd8   :  { %1946 = vmatpush2.bf16.msra.mxu1 %v2379_v7  ;;  %v233_v7 = vld [vmem:[#allocation8 + $0x178] sm:$0xff] }
  0xd9   :  { %1947 = vmatprep.subr.bf16.mxu1 %v2372_v9  ;;  %v361_v9 = vld [vmem:[#allocation8 + $0x578] sm:$0xff]  ;;  %v2182_v12 = vcombine.high %v229_v6, %v233_v7  ;;  %v2181_v18 = vcombine.low %v229_v6, %v233_v7 }
  0xda   :  { %1907 = vmatpush2.bf16.msra.mxu0 %v2243_v14  ;;  %v2310_v13 = vcombine.high %v357_v8, %v361_v9  ;;  %v221_v14 = vld [vmem:[#allocation8 + $0x118] sm:$0xff]  ;;  %v2309_v19 = vcombine.low %v357_v8, %v361_v9 }
  0xdb   :  { %1908 = vmatprep.subr.bf16.mxu0 %v2236_v16  ;;  %v349_v16 = vld [vmem:[#allocation8 + $0x518] sm:$0xff] }
  0xdc   :  { %1948 = vmatpush2.bf16.msra.mxu1 %v2371_v15  ;;  %v225_v15 = vld [vmem:[#allocation8 + $0x138] sm:$0xff] }
  0xdd   :  { %1949 = vmatprep.subr.bf16.mxu1 %v2364_v17  ;;  %v353_v17 = vld [vmem:[#allocation8 + $0x538] sm:$0xff]  ;;  %v2174_v20 = vcombine.high %v221_v14, %v225_v15  ;;  %v2173_v26 = vcombine.low %v221_v14, %v225_v15 }
  0xde   :  { %1909 = vmatpush2.bf16.msra.mxu0 %v2235_v22  ;;  %v2302_v21 = vcombine.high %v349_v16, %v353_v17  ;;  %v213_v22 = vld [vmem:[#allocation8 + $0xd8] sm:$0xff] }
  0xdf   :  { %1910 = vmatprep.subr.bf16.mxu0 %v2228_v24  ;;  %v341_v24 = vld [vmem:[#allocation8 + $0x4d8] sm:$0xff] }
  0xe0   :  { %1950 = vmatpush2.bf16.msra.mxu1 %v2363_v23  ;;  %v217_v23 = vld [vmem:[#allocation8 + $0xf8] sm:$0xff] }
  0xe1   :  { %1951 = vmatprep.subr.bf16.mxu1 %v2356_v25  ;;  %v345_v25 = vld [vmem:[#allocation8 + $0x4f8] sm:$0xff]  ;;  %v2166_v27 = vcombine.high %v213_v22, %v217_v23 }
  0xe2   :  { %1911 = vmatpush2.bf16.msra.mxu0 %v2227_v30  ;;  %v333_v30 = vld [vmem:[#allocation8 + $0x498] sm:$0xff] }
  0xe3   :  { %1912 = vmatprep.subr.bf16.mxu0 %v2220_v32  ;;  %v2165_v32 = vcombine.low %v213_v22, %v217_v23  ;;  %v189_v45 = vld [vmem:[#allocation8 + $0x18] sm:$0xff] }
  0xe4   :  { %1952 = vmatpush2.bf16.msra.mxu1 %v2355_v31  ;;  %v337_v31 = vld [vmem:[#allocation8 + $0x4b8] sm:$0xff] }
  0xe5   :  { %1953 = vmatprep.subr.bf16.mxu1 %v2348_v33  ;;  %v2293_v33 = vcombine.low %v341_v24, %v345_v25  ;;  %v2286_v35 = vcombine.high %v333_v30, %v337_v31  ;;  %v193_v46 = vld [vmem:[#allocation8 + $0x38] sm:$0xff] }
  0xe6   :  { %1913 = vmatpush2.bf16.msra.mxu0 %v2219_v38  ;;  %v325_v38 = vld [vmem:[#allocation8 + $0x458] sm:$0xff]  ;;  %v2142_v52 = vcombine.high %v189_v45, %v193_v46 }
  0xe7   :  { %1914 = vmatprep.subr.bf16.mxu0 %v2212_v40  ;;  %v2157_v40 = vcombine.low %v205_v28, %v209_v29  ;;  %v309_v54 = vld [vmem:[#allocation8 + $0x3d8] sm:$0xff] }
  0xe8   :  { %1954 = vmatpush2.bf16.msra.mxu1 %v2347_v39  ;;  %v329_v39 = vld [vmem:[#allocation8 + $0x478] sm:$0xff] }
  0xe9   :  { %1955 = vmatprep.subr.bf16.mxu1 %v2340_v41  ;;  %v2285_v41 = vcombine.low %v333_v30, %v337_v31  ;;  %v2278_v43 = vcombine.high %v325_v38, %v329_v39  ;;  %v313_v55 = vld [vmem:[#allocation8 + $0x3f8] sm:$0xff] }
  0xea   :  { %1915 = vmatpush2.bf16.msra.mxu0 %v2211_v48  ;;  %v317_v48 = vld [vmem:[#allocation8 + $0x418] sm:$0xff]  ;;  %v2262_v61 = vcombine.high %v309_v54, %v313_v55 }
  0xeb   :  { %1916 = vmatprep.subr.bf16.mxu0 %v2204_v50  ;;  %v2149_v50 = vcombine.low %v197_v36, %v201_v37  ;;  %v301_v63 = vld [vmem:[#allocation8 + $0x398] sm:$0xff] }
  0xec   :  { %1956 = vmatpush2.bf16.msra.mxu1 %v2339_v49  ;;  %v321_v49 = vld [vmem:[#allocation8 + $0x438] sm:$0xff] }
  0xed   :  { %1957 = vmatprep.subr.bf16.mxu1 %v2332_v51  ;;  %v2277_v51 = vcombine.low %v325_v38, %v329_v39  ;;  %v2270_v53 = vcombine.high %v317_v48, %v321_v49  ;;  %v305_v0 = vld [vmem:[#allocation8 + $0x3b8] sm:$0xff] }
  0xee   :  { %1917 = vmatpush2.bf16.msra.mxu0 %v2203_v56  ;;  %v437_v56 = vld [vmem:[#allocation8 + $0x7d8] sm:$0xff]  ;;  %v2254_v6 = vcombine.high %v301_v63, %v305_v0 }
  0xef   :  { %1968 = vmatprep.subr.bf16.mxu0 %v2198_v58  ;;  %v2141_v58 = vcombine.low %v189_v45, %v193_v46  ;;  %v293_v8 = vld [vmem:[#allocation8 + $0x358] sm:$0xff] }
  0xf0   :  { %1958 = vmatpush2.bf16.msra.mxu1 %v2331_v57  ;;  %v441_v57 = vld [vmem:[#allocation8 + $0x7f8] sm:$0xff] }
  0xf1   :  { %2009 = vmatprep.subr.bf16.mxu1 %v2326_v60  ;;  %1919 = vmatmul.mubr.bf16.vlgmr.msra.gmra.mxu0 %v2693_v44  ;;  %v2269_v60 = vcombine.low %v317_v48, %v321_v49  ;;  %v2390_v62 = vcombine.high %v437_v56, %v441_v57  ;;  %v297_v9 = vld [vmem:[#allocation8 + $0x378] sm:$0xff] }
  0xf2   :  { %1969 = vmatpush1.bf16.msra.mxu0 %v2197_v1  ;;  %2000 = vmatprep.mubr.bf16.mxu0 %v2628_v59  ;;  %v2301_v59 = vcombine.low %v349_v16, %v353_v17  ;;  %v429_v1 = vld [vmem:[#allocation8 + $0x798] sm:$0xff]  ;;  %v2246_v14 = vcombine.high %v293_v8, %v297_v9 }
  0xf3   :  { %1960 = vmatmul.mubr.bf16.vlgmr.msra.gmra.mxu1 %v2695_v47  ;;  %1970 = vmatprep.subr.bf16.mxu0 %v2190_v3  ;;  %v2261_v3 = vcombine.low %v309_v54, %v313_v55  ;;  %v285_v16 = vld [vmem:[#allocation8 + $0x318] sm:$0xff] }
  0xf4   :  { %2010 = vmatpush1.bf16.msra.mxu1 %v2325_v2  ;;  %2041 = vmatprep.mubr.bf16.mxu1 %v2636_v4  ;;  %v2294_v4 = vcombine.high %v341_v24, %v345_v25  ;;  %v433_v2 = vld [vmem:[#allocation8 + $0x7b8] sm:$0xff] }
  0xf5   :  { %2011 = vmatprep.subr.bf16.mxu1 %v2318_v5  ;;  %v2389_v5 = vcombine.low %v437_v56, %v441_v57  ;;  %v2382_v7 = vcombine.high %v429_v1, %v433_v2  ;;  %v289_v17 = vld [vmem:[#allocation8 + $0x338] sm:$0xff] }
  0xf6   :  { %1971 = vmatpush1.bf16.msra.mxu0 %v2189_v10  ;;  %v421_v10 = vld [vmem:[#allocation8 + $0x758] sm:$0xff]  ;;  %v2238_v22 = vcombine.high %v285_v16, %v289_v17 }
  0xf7   :  { %1972 = vmatprep.subr.bf16.mxu0 %v2182_v12  ;;  %v2253_v12 = vcombine.low %v301_v63, %v305_v0  ;;  %v277_v24 = vld [vmem:[#allocation8 + $0x2d8] sm:$0xff] }
  0xf8   :  { %2012 = vmatpush1.bf16.msra.mxu1 %v2317_v11  ;;  %v425_v11 = vld [vmem:[#allocation8 + $0x778] sm:$0xff] }
  0xf9   :  { %2013 = vmatprep.subr.bf16.mxu1 %v2310_v13  ;;  %v2381_v13 = vcombine.low %v429_v1, %v433_v2  ;;  %v2374_v15 = vcombine.high %v421_v10, %v425_v11  ;;  %v281_v25 = vld [vmem:[#allocation8 + $0x2f8] sm:$0xff] }
  0xfa   :  { %1973 = vmatpush1.bf16.msra.mxu0 %v2181_v18  ;;  %v413_v18 = vld [vmem:[#allocation8 + $0x718] sm:$0xff]  ;;  %v2230_v28 = vcombine.high %v277_v24, %v281_v25 }
  0xfb   :  { %1974 = vmatprep.subr.bf16.mxu0 %v2174_v20  ;;  %v2245_v20 = vcombine.low %v293_v8, %v297_v9  ;;  %v269_v30 = vld [vmem:[#allocation8 + $0x298] sm:$0xff] }
  0xfc   :  { %2014 = vmatpush1.bf16.msra.mxu1 %v2309_v19  ;;  %v417_v19 = vld [vmem:[#allocation8 + $0x738] sm:$0xff] }
  0xfd   :  { %2015 = vmatprep.subr.bf16.mxu1 %v2302_v21  ;;  %v2373_v21 = vcombine.low %v421_v10, %v425_v11  ;;  %v2366_v23 = vcombine.high %v413_v18, %v417_v19  ;;  %v273_v31 = vld [vmem:[#allocation8 + $0x2b8] sm:$0xff] }
  0xfe   :  { %1975 = vmatpush1.bf16.msra.mxu0 %v2173_v26  ;;  %v405_v26 = vld [vmem:[#allocation8 + $0x6d8] sm:$0xff]  ;;  %v2222_v36 = vcombine.high %v269_v30, %v273_v31 }
  0xff   :  { %1976 = vmatprep.subr.bf16.mxu0 %v2166_v27  ;;  %v2237_v27 = vcombine.low %v285_v16, %v289_v17  ;;  %v261_v38 = vld [vmem:[#allocation8 + $0x258] sm:$0xff] }
 0x100   :  { %2016 = vmatpush1.bf16.msra.mxu1 %v2301_v59  ;;  %v409_v59 = vld [vmem:[#allocation8 + $0x6f8] sm:$0xff] }
 0x101   :  { %2017 = vmatprep.subr.bf16.mxu1 %v2294_v4  ;;  %v2365_v4 = vcombine.low %v413_v18, %v417_v19  ;;  %v2358_v29 = vcombine.high %v405_v26, %v409_v59  ;;  %v265_v39 = vld [vmem:[#allocation8 + $0x278] sm:$0xff] }
 0x102   :  { %1977 = vmatpush1.bf16.msra.mxu0 %v2165_v32  ;;  %v397_v32 = vld [vmem:[#allocation8 + $0x698] sm:$0xff]  ;;  %v2214_v45 = vcombine.high %v261_v38, %v265_v39 }
 0x103   :  { %1978 = vmatprep.subr.bf16.mxu0 %v2158_v34  ;;  %v2229_v34 = vcombine.low %v277_v24, %v281_v25  ;;  %v253_v48 = vld [vmem:[#allocation8 + $0x218] sm:$0xff] }
 0x104   :  { %2018 = vmatpush1.bf16.msra.mxu1 %v2293_v33  ;;  %v401_v33 = vld [vmem:[#allocation8 + $0x6b8] sm:$0xff] }
 0x105   :  { %2019 = vmatprep.subr.bf16.mxu1 %v2286_v35  ;;  %v2357_v35 = vcombine.low %v405_v26, %v409_v59  ;;  %v2350_v37 = vcombine.high %v397_v32, %v401_v33  ;;  %v257_v49 = vld [vmem:[#allocation8 + $0x238] sm:$0xff] }
 0x106   :  { %1979 = vmatpush1.bf16.msra.mxu0 %v2157_v40  ;;  %v389_v40 = vld [vmem:[#allocation8 + $0x658] sm:$0xff]  ;;  %v2206_v54 = vcombine.high %v253_v48, %v257_v49  ;;  %v2205_v56 = vcombine.low %v253_v48, %v257_v49 }
 0x107   :  { %1980 = vmatprep.subr.bf16.mxu0 %v2150_v42  ;;  %v2221_v42 = vcombine.low %v269_v30, %v273_v31 }
 0x108   :  { %2020 = vmatpush1.bf16.msra.mxu1 %v2285_v41  ;;  %v393_v41 = vld [vmem:[#allocation8 + $0x678] sm:$0xff] }
 0x109   :  { %2021 = vmatprep.subr.bf16.mxu1 %v2278_v43  ;;  %v2349_v43 = vcombine.low %v397_v32, %v401_v33  ;;  %v2342_v46 = vcombine.high %v389_v40, %v393_v41 }
 0x10a   :  { %1981 = vmatpush1.bf16.msra.mxu0 %v2149_v50  ;;  %v381_v50 = vld [vmem:[#allocation8 + $0x618] sm:$0xff] }
 0x10b   :  { %1982 = vmatprep.subr.bf16.mxu0 %v2142_v52  ;;  %v2213_v52 = vcombine.low %v261_v38, %v265_v39 }
 0x10c   :  { %2022 = vmatpush1.bf16.msra.mxu1 %v2277_v51  ;;  %v385_v51 = vld [vmem:[#allocation8 + $0x638] sm:$0xff] }
 0x10d   :  { %2023 = vmatprep.subr.bf16.mxu1 %v2270_v53  ;;  %v2341_v53 = vcombine.low %v389_v40, %v393_v41  ;;  %v2334_v55 = vcombine.high %v381_v50, %v385_v51  ;;  %v2333_v57 = vcombine.low %v381_v50, %v385_v51 }
 0x10e   :  { %1983 = vmatpush1.bf16.msra.mxu0 %v2141_v58 }
 0x10f   :  { %1984 = vmatprep.subr.bf16.mxu0 %v2262_v61 }
 0x110   :  { %2024 = vmatpush1.bf16.msra.mxu1 %v2269_v60 }
 0x111   :  { %2025 = vmatprep.subr.bf16.mxu1 %v2390_v62 }
 0x112   :  { %1985 = vmatpush2.bf16.msra.mxu0 %v2261_v3 }
 0x113   :  { %1986 = vmatprep.subr.bf16.mxu0 %v2254_v6 }
 0x114   :  { %2026 = vmatpush2.bf16.msra.mxu1 %v2389_v5 }
 0x115   :  { %2027 = vmatprep.subr.bf16.mxu1 %v2382_v7 }
 0x116   :  { %1987 = vmatpush2.bf16.msra.mxu0 %v2253_v12 }
 0x117   :  { %1988 = vmatprep.subr.bf16.mxu0 %v2246_v14 }
 0x118   :  { %2028 = vmatpush2.bf16.msra.mxu1 %v2381_v13 }
 0x119   :  { %2029 = vmatprep.subr.bf16.mxu1 %v2374_v15 }
 0x11a   :  { %1989 = vmatpush2.bf16.msra.mxu0 %v2245_v20 }
 0x11b   :  { %1990 = vmatprep.subr.bf16.mxu0 %v2238_v22 }
 0x11c   :  { %2030 = vmatpush2.bf16.msra.mxu1 %v2373_v21 }
 0x11d   :  { %2031 = vmatprep.subr.bf16.mxu1 %v2366_v23 }
 0x11e   :  { %1991 = vmatpush2.bf16.msra.mxu0 %v2237_v27 }
 0x11f   :  { %1992 = vmatprep.subr.bf16.mxu0 %v2230_v28 }
 0x120   :  { %2032 = vmatpush2.bf16.msra.mxu1 %v2365_v4 }
 0x121   :  { %2033 = vmatprep.subr.bf16.mxu1 %v2358_v29 }
 0x122   :  { %1993 = vmatpush2.bf16.msra.mxu0 %v2229_v34 }
 0x123   :  { %1994 = vmatprep.subr.bf16.mxu0 %v2222_v36 }
 0x124   :  { %2034 = vmatpush2.bf16.msra.mxu1 %v2357_v35 }
 0x125   :  { %2035 = vmatprep.subr.bf16.mxu1 %v2350_v37 }
 0x126   :  { %1995 = vmatpush2.bf16.msra.mxu0 %v2221_v42 }
 0x127   :  { %1996 = vmatprep.subr.bf16.mxu0 %v2214_v45 }
 0x128   :  { %2036 = vmatpush2.bf16.msra.mxu1 %v2349_v43 }
 0x129   :  { %2037 = vmatprep.subr.bf16.mxu1 %v2342_v46 }
 0x12a   :  { %1997 = vmatpush2.bf16.msra.mxu0 %v2213_v52 }
 0x12b   :  { %1998 = vmatprep.subr.bf16.mxu0 %v2206_v54 }
 0x12c   :  { %2038 = vmatpush2.bf16.msra.mxu1 %v2341_v53 }
 0x12d   :  { %2039 = vmatprep.subr.bf16.mxu1 %v2334_v55 }
 0x12e   :  { %1999 = vmatpush2.bf16.msra.mxu0 %v2205_v56 }
 0x130   :  { %2040 = vmatpush2.bf16.msra.mxu1 %v2333_v57 }
 0x131   :  { %v1756_v58 = vpop.f32.mrf.mxu0  ;;  %2001 = vmatmul.mubr.bf16.vlgmr.msra.gmra.mxu0 %v2693_v44 }
 0x133   :  { %v1797_v60 = vpop.f32.mrf.mxu1  ;;  %2042 = vmatmul.mubr.bf16.vlgmr.msra.gmra.mxu1 %v2695_v47  ;;  %v1758_v62 = vpop.f32.mrf.mxu0 }
 0x134   :  { %v1798_v61 = vadd.f32 %v1797_v60, %v1756_v58 }
 0x135   :  { %v1799_v63 = vpop.f32.mrf.mxu1  ;;  %v1760_v1 = vpop.f32.mrf.mxu0 }
 0x136   :  { %v1800_v0 = vadd.f32 %v1799_v63, %v1758_v62 }
 0x137   :  { %v1801_v2 = vpop.f32.mrf.mxu1  ;;  %v1761_v5 = vpop.f32.mrf.mxu0 }
 0x138   :  { %v2050_v3 = vmax.f32 %v1798_v61, %v1800_v0 }
 0x139   :  { %v1802_v6 = vpop.f32.mrf.mxu1 }
 0x171   :  { %v1838_v7 = vpop.f32.mrf.mxu0 }
 0x173   :  { %v1879_v8 = vpop.f32.mrf.mxu1  ;;  %v1840_v10 = vpop.f32.mrf.mxu0 }
 0x174   :  { %v1880_v9 = vadd.f32 %v1879_v8, %v1838_v7 }
 0x175   :  { %v1881_v11 = vpop.f32.mrf.mxu1  ;;  %v1842_v44 = vpop.f32.mrf.mxu0 }
 0x176   :  { %v2051_v12 = vmax.f32 %v2050_v3, %v1880_v9  ;;  %v1882_v13 = vadd.f32 %v1881_v11, %v1840_v10 }
 0x177   :  { %v1883_v14 = vpop.f32.mrf.mxu1  ;;  %v1843_v47 = vpop.f32.mrf.mxu0 }
 0x178   :  { %v2052_v15 = vmax.f32 %v2051_v12, %v1882_v13 }
 0x179   :  { %v1884_v16 = vpop.f32.mrf.mxu1 }
 0x1b1   :  { %v1920_v17 = vpop.f32.mrf.mxu0 }
 0x1b3   :  { %v1961_v18 = vpop.f32.mrf.mxu1  ;;  %v1922_v19 = vpop.f32.mrf.mxu0 }
 0x1b4   :  { %v1962_v25 = vadd.f32 %v1961_v18, %v1920_v17 }
 0x1b5   :  { %v1963_v20 = vpop.f32.mrf.mxu1  ;;  %v1924_v21 = vpop.f32.mrf.mxu0 }
 0x1b6   :  { %v2053_v26 = vmax.f32 %v2052_v15, %v1962_v25  ;;  %v1964_v59 = vadd.f32 %v1963_v20, %v1922_v19 }
 0x1b7   :  { %v1965_v22 = vpop.f32.mrf.mxu1  ;;  %v1925_v23 = vpop.f32.mrf.mxu0 }
 0x1b8   :  { %v2054_v28 = vmax.f32 %v2053_v26, %v1964_v59 }
 0x1b9   :  { %v1966_v24 = vpop.f32.mrf.mxu1 }
 0x1f1   :  { %v2002_v27 = vpop.f32.mrf.mxu0 }
 0x1f3   :  { %v2043_v4 = vpop.f32.mrf.mxu1  ;;  %v2004_v30 = vpop.f32.mrf.mxu0 }
 0x1f4   :  { %v2044_v29 = vadd.f32 %v2043_v4, %v2002_v27 }
 0x1f5   :  { %v2045_v31 = vpop.f32.mrf.mxu1  ;;  %v2006_v34 = vpop.f32.mrf.mxu0 }
 0x1f6   :  { %v2055_v32 = vmax.f32 %v2054_v28, %v2044_v29  ;;  %v2046_v33 = vadd.f32 %v2045_v31, %v2004_v30 }
 0x1f7   :  { %v2047_v35 = vpop.f32.mrf.mxu1  ;;  %v2007_v37 = vpop.f32.mrf.mxu0 }
 0x1f8   :  { %v2056_v36 = vmax.f32 %v2055_v32, %v2046_v33 }
 0x1f9   :  { %v2048_v38 = vpop.f32.mrf.mxu1 }
 0x1fa   :  { %v2057_v39 = vsub.f32 %v1798_v61, %v2056_v36  ;;  %v2060_v40 = vsub.f32 %v1800_v0, %v2056_v36  ;;  %v2063_v41 = vsub.f32 %v1880_v9, %v2056_v36  ;;  %v2066_v42 = vsub.f32 %v1882_v13, %v2056_v36 }
 0x1fb   :  { %v2069_v43 = vsub.f32 %v1962_v25, %v2056_v36  ;;  %v2072_v49 = vsub.f32 %v1964_v59, %v2056_v36  ;;  %v2075_v52 = vsub.f32 %v2044_v29, %v2056_v36  ;;  %v2078_v53 = vsub.f32 %v2046_v33, %v2056_v36 }
 0x1fc   :  { %v2058_v45 = vmul.f32 1.442695, %v2057_v39  ;;  %v2061_v46 = vmul.f32 1.442695, %v2060_v40  ;;  %v2064_v48 = vmul.f32 1.442695, %v2063_v41 }
 0x1fd   :  { %v2067_v50 = vmul.f32 1.442695, %v2066_v42  ;;  %v2070_v51 = vmul.f32 1.442695, %v2069_v43  ;;  %v2073_v54 = vmul.f32 1.442695, %v2072_v49 }
 0x1fe   :  { %2397 = vpow2.f32 %v2058_v45  ;;  %v2076_v55 = vmul.f32 1.442695, %v2075_v52  ;;  %v2079_v56 = vmul.f32 1.442695, %v2078_v53 }
 0x1ff   :  { %2399 = vpow2.f32 %v2061_v46 }
 0x200   :  { %2401 = vpow2.f32 %v2064_v48 }
 0x201   :  { %2403 = vpow2.f32 %v2067_v50 }
 0x202   :  { %2405 = vpow2.f32 %v2070_v51 }
 0x203   :  { %2407 = vpow2.f32 %v2073_v54 }
 0x204   :  { %2409 = vpow2.f32 %v2076_v55 }
 0x205   :  { %2411 = vpow2.f32 %v2079_v56 }
 0x20b   :  { %v2398_v57 = vpop.eup %2397 }
 0x20c   :  { %v2400_v58 = vpop.eup %2399 }
 0x20d   :  { %v2402_v60 = vpop.eup %2401  ;;  %v2081_v61 = vadd.f32 %v2400_v58, %v2398_v57 }
 0x20e   :  { %v2404_v62 = vpop.eup %2403  ;;  %v2089_v63 = vmul.f32 2.0, %v2402_v60 }
 0x20f   :  { %v2406_v0 = vpop.eup %2405  ;;  %v2082_v1 = vadd.f32 %v2402_v60, %v2081_v61  ;;  %v2091_v3 = vmul.f32 3.0, %v2404_v62 }
 0x210   :  { %v2090_v2 = vadd.f32 %v2400_v58, %v2089_v63  ;;  %v2408_v5 = vpop.eup %2407  ;;  %v2093_v8 = vmul.f32 4.0, %v2406_v0 }
 0x211   :  { %v2083_v6 = vadd.f32 %v2404_v62, %v2082_v1  ;;  %v2410_v9 = vpop.eup %2409  ;;  %v2095_v12 = vmul.f32 5.0, %v2408_v5 }
 0x212   :  { %v2092_v7 = vadd.f32 %v2091_v3, %v2090_v2  ;;  %v2412_v13 = vpop.eup %2411  ;;  %v2097_v15 = vmul.f32 6.0, %v2410_v9 }
 0x213   :  { %v2084_v10 = vadd.f32 %v2406_v0, %v2083_v6  ;;  %v2099_v17 = vmul.f32 7.0, %v2412_v13 }
 0x214   :  { %v2094_v11 = vadd.f32 %v2093_v8, %v2092_v7 }
 0x215   :  { %v2085_v44 = vadd.f32 %v2408_v5, %v2084_v10 }
 0x216   :  { %v2096_v14 = vadd.f32 %v2095_v12, %v2094_v11 }
 0x217   :  { %v2086_v47 = vadd.f32 %v2410_v9, %v2085_v44 }
 0x218   :  { %v2098_v16 = vadd.f32 %v2097_v15, %v2096_v14 }
 0x219   :  { %v2087_v18 = vadd.f32 %v2412_v13, %v2086_v47 }
 0x21a   :  { %v2100_v19 = vadd.f32 %v2099_v17, %v2098_v16 }
 0x21b   :  { %2413 = vrcp.f32 %v2087_v18 }
 0x228   :  { %v2414_v20 = vpop.eup %2413 }
 0x229   :  { %v2102_v21 = vmul.f32 %v2414_v20, %v2100_v19 }
 0x22b   :  { %2103 = vst [vmem:[#allocation9] sm:$0x3] %v2102_v21 }
 0x22c   :  { %2470 = shalt.err (!%p2467_p5)
}
 0x22d   :  { %2113 = dma.vmem_to_hbm [thread:$0]  %s2111_s9, 32, %s2718_s4, [#allocation4]  }
 0x22e   :  { %2485 = dma.done.wait [#allocation4], 32  }
 0x22f   :  { %2486 = vsyncadd [#allocation4], 4294967264 }
 0x230   :  { %2117 = vsyncpa [#allocation3], 1 }
 0x231   :  { %2118 = vsyncpa [#allocation4], 1 }
 0x232   :  { %2119 = vsyncpa [#allocation5], 1 }
 0x233   :  { %2120 = vsyncpa [#allocation7], 1 }

</bundles_post_ra>
